<compile_context>
chip_gen: v6e
topology: v6e:2x2x1
jax: 0.10.0
libtpu: 0.0.40
codegen_flags: <defaults>
</compile_context>

<pallas_src>
import numpy as np
import jax
import jax.numpy as jnp
from jax import lax
from jax.experimental import pallas as pl
from jax.experimental.pallas import tpu as pltpu

EPS = 1e-5          # BatchNorm1d eps (PyTorch default)
NEG_INF = -1e30     # finite "-inf" so exp(m_prev - m_new) never sees inf - inf


# ---------------------------------------------------------------------------
# Kernel 1 (per layer, runs once): BN + fused q/k/v projection.
# ---------------------------------------------------------------------------
def _bn_qkv_kernel(ft_ref, gamma_ref, beta_ref, wqkv_ref, bqkv_ref,
                   xn_ref, q_ref, k_ref, v_ref):
    ft = ft_ref[...]                                        # [N, D]
    mean = jnp.mean(ft, axis=0, keepdims=True)
    var = jnp.mean((ft - mean) ** 2, axis=0, keepdims=True)
    xn = gamma_ref[...] * (ft - mean) * lax.rsqrt(var + EPS) + beta_ref[...]
    xn_ref[...] = xn
    # one wide matmul instead of three D=32 matmuls
    qkv = jnp.dot(xn, wqkv_ref[...].T,
                  preferred_element_type=jnp.float32) + bqkv_ref[...]   # [N, 3D]
    D = q_ref.shape[-1]
    q_ref[...] = qkv[:, :D]          # fc_q (bias folded into bqkv)
    k_ref[...] = qkv[:, D:2 * D]     # fc_k (no bias)
    v_ref[...] = qkv[:, 2 * D:]      # fc_v (no bias)


def _bn_qkv_forward(ft, gamma, beta, w_qkv, b_qkv):
    N, D = ft.shape
    full = lambda i: (0, 0)
    out_sds = jax.ShapeDtypeStruct((N, D), jnp.float32)
    return pl.pallas_call(
        _bn_qkv_kernel,
        out_shape=(out_sds,) * 4,
        grid_spec=pltpu.PrefetchScalarGridSpec(
            num_scalar_prefetch=0,
            grid=(1,),
            in_specs=[pl.BlockSpec((N, D), full),
                      pl.BlockSpec((1, D), full),
                      pl.BlockSpec((1, D), full),
                      pl.BlockSpec((3 * D, D), full),
                      pl.BlockSpec((1, 3 * D), full)],
            out_specs=(pl.BlockSpec((N, D), full),) * 4,
        ),
        compiler_params=pltpu.CompilerParams(
            dimension_semantics=("arbitrary",),
            vmem_limit_bytes=64 * 1024 * 1024),
    )(ft, gamma, beta, w_qkv, b_qkv)


# ---------------------------------------------------------------------------
# Kernel 2: attention + aggregation + fused output projection + PReLU + resid.
# grid = (dst tiles [parallel], src tiles [arbitrary / online softmax]).
# ---------------------------------------------------------------------------
def _attn_agg_kernel(q_ref, k_ref, v_ref, xd_ref, ftd_ref, adj_ref,
                     attn_e_ref, wout_ref, bout_ref, slope_ref,
                     out_ref, m_scr, l_scr, acc_scr):
    j = pl.program_id(1)

    @pl.when(j == 0)
    def _init():
        m_scr[...] = jnp.full(m_scr.shape, NEG_INF, jnp.float32)
        l_scr[...] = jnp.zeros(l_scr.shape, jnp.float32)
        acc_scr[...] = jnp.zeros(acc_scr.shape, jnp.float32)

    q = q_ref[...]                                   # [Ts, D]  src-node queries
    k = k_ref[...]                                   # [Td, D]  dst-node keys
    mask = adj_ref[...].astype(jnp.float32) > 0.0    # [Td, Ts] edge u->d exists

    # per-edge logit e[d,u] = sum_c attn_e[c] * sigmoid(q[u,c] + k[d,c])
    # TODO(synk): optional edge 'cnt' embedding (ft_e) not present here.
    s = jax.nn.sigmoid(q[None, :, :] + k[:, None, :])            # [Td, Ts, D]
    e = jnp.sum(attn_e_ref[...][None, :, :] * s, axis=-1)        # [Td, Ts]
    e = jnp.where(mask, e, NEG_INF)

    # online (flash-style) masked softmax over the src axis
    m_prev = m_scr[...]
    m_new = jnp.maximum(m_prev, jnp.max(e, axis=-1, keepdims=True))
    rescale = jnp.exp(m_prev - m_new)
    p = jnp.where(mask, jnp.exp(e - m_new), 0.0)                 # [Td, Ts]
    l_scr[...] = rescale * l_scr[...] + jnp.sum(p, axis=-1, keepdims=True)
    acc_scr[...] = rescale * acc_scr[...] + jnp.dot(
        p, v_ref[...], preferred_element_type=jnp.float32)
    m_scr[...] = m_new

    @pl.when(j == pl.num_programs(1) - 1)
    def _finalize():
        # NOTE: a zero-in-degree dst row yields an all-zero attention row here
        # (DGL edge_softmax would give NaN); the harness forces self-loops.
        inv_l = pl.reciprocal(jnp.maximum(l_scr[...], 1e-30), approx=True)
        agg = acc_scr[...] * inv_l                               # [Td, D]
        cat = jnp.concatenate([agg, xd_ref[...]], axis=-1)       # [Td, 2D]
        z = jnp.dot(cat, wout_ref[...].T,
                    preferred_element_type=jnp.float32) + bout_ref[...]
        out = jnp.where(z >= 0.0, z, slope_ref[...] * z)         # PReLU
        out_ref[...] = out + ftd_ref[...]                        # residual


def _attn_agg_forward(ft, xn, q, k, v, adj, attn_e, w_out, b_out, slope, *,
                      tile_d, tile_s):
    N, D = ft.shape
    grid = (N // tile_d, N // tile_s)
    row_d = lambda i, j: (i, 0)
    row_s = lambda i, j: (j, 0)
    full = lambda i, j: (0, 0)
    in_specs = [
        pl.BlockSpec((tile_s, D), row_s),                     # q   (src tile)
        pl.BlockSpec((tile_d, D), row_d),                     # k   (dst tile)
        pl.BlockSpec((tile_s, D), row_s),                     # v   (src tile)
        pl.BlockSpec((tile_d, D), row_d),                     # xn  (dst, linear_self)
        pl.BlockSpec((tile_d, D), row_d),                     # ft  (dst, residual)
        pl.BlockSpec((tile_d, tile_s), lambda i, j: (i, j)),  # adjacency (int8)
        pl.BlockSpec((1, D), full),                           # attn_e
        pl.BlockSpec((D, 2 * D), full),                       # [wagg | wself]
        pl.BlockSpec((1, D), full),                           # bagg
        pl.BlockSpec((1, D), full),                           # PReLU slope
    ]
    out_spec = pl.BlockSpec((tile_d, D), row_d)
    return pl.pallas_call(
        _attn_agg_kernel,
        out_shape=jax.ShapeDtypeStruct((N, D), jnp.float32),
        grid_spec=pltpu.PrefetchScalarGridSpec(
            num_scalar_prefetch=0,
            grid=grid,
            in_specs=in_specs,
            out_specs=out_spec,
            scratch_shapes=[pltpu.VMEM((tile_d, 1), jnp.float32),   # running max
                            pltpu.VMEM((tile_d, 1), jnp.float32),   # running denom
                            pltpu.VMEM((tile_d, D), jnp.float32)],  # running numer
        ),
        compiler_params=pltpu.CompilerParams(
            dimension_semantics=("parallel", "arbitrary"),
            vmem_limit_bytes=64 * 1024 * 1024),
    )(q, k, v, xn, ft, adj, attn_e, w_out, b_out, slope)


# ---------------------------------------------------------------------------
# Layer / stack wrappers.
# ---------------------------------------------------------------------------
def _pick_tile(n, cap=128):
    if n <= cap:
        return n
    assert n % cap == 0, f"N={n} must be a multiple of {cap} (or <= {cap})"
    return cap


def kg_layer_forward(ft, adj, params, *, tile_d=None, tile_s=None):
    """One HeteroAttentionAggregationLayer forward + residual (single ntype)."""
    N, D = ft.shape
    tile_d = _pick_tile(N) if tile_d is None else tile_d
    tile_s = _pick_tile(N) if tile_s is None else tile_s
    assert N % tile_d == 0 and N % tile_s == 0
    # Fused weights (widen the tiny D=32 matmuls for the MXU).
    w_qkv = jnp.concatenate([params["wq"], params["wk"], params["wv"]], axis=0)  # [3D, D]
    b_qkv = jnp.concatenate([params["bq"], jnp.zeros((1, 2 * D), jnp.float32)], axis=1)
    w_out = jnp.concatenate([params["wagg"], params["wself"]], axis=1)           # [D, 2D]
    # Hoisted pre-pass: BN + q/k/v computed once per layer (not per dst tile).
    xn, q, k, v = _bn_qkv_forward(ft, params["gamma"], params["beta"], w_qkv, b_qkv)
    return _attn_agg_forward(ft, xn, q, k, v, adj, params["attn_e"], w_out,
                             params["bagg"], params["alpha"],
                             tile_d=tile_d, tile_s=tile_s)


def kg_embedding_forward(ft, adjs, layer_params, *, tile_d=None, tile_s=None):
    """KnowledgeGraphEmbeddingLayer.forward: stack of layers, residual=True."""
    feats = ft
    for adj, p in zip(adjs, layer_params):
        feats = kg_layer_forward(feats, adj, p, tile_d=tile_d, tile_s=tile_s)
    return feats


# ---------------- pure-JAX reference (for correctness check) ----------------
def _kg_layer_reference(ft, adj, p):
    mean = jnp.mean(ft, axis=0, keepdims=True)
    var = jnp.mean((ft - mean) ** 2, axis=0, keepdims=True)
    xn = p["gamma"] * (ft - mean) / jnp.sqrt(var + EPS) + p["beta"]
    q = xn @ p["wq"].T + p["bq"]
    k = xn @ p["wk"].T
    v = xn @ p["wv"].T
    e = jnp.einsum("c,duc->du", p["attn_e"][0],
                   jax.nn.sigmoid(q[None, :, :] + k[:, None, :]))
    mask = adj > 0
    e = jnp.where(mask, e, -jnp.inf)
    a = jax.nn.softmax(e, axis=-1)
    a = jnp.where(mask, a, 0.0)
    agg = a @ v
    z = agg @ p["wagg"].T + p["bagg"] + xn @ p["wself"].T
    out = jnp.where(z >= 0.0, z, p["alpha"] * z)
    return out + ft


# ---------------- deterministic parameter initialization ----------------
def init_layer_params(key, D):
    ks = jax.random.split(key, 8)
    bound = 1.0 / np.sqrt(D)
    u = lambda k, shape: jax.random.uniform(k, shape, jnp.float32, -bound, bound)
    return {
        "gamma":  jnp.ones((1, D), jnp.float32),        # BatchNorm1d weight
        "beta":   jnp.zeros((1, D), jnp.float32),       # BatchNorm1d bias
        "wq":     u(ks[0], (D, D)),                     # fc_q weight [out, in]
        "bq":     u(ks[1], (1, D)),                     # fc_q bias
        "wk":     u(ks[2], (D, D)),                     # fc_k weight (no bias)
        "wv":     u(ks[3], (D, D)),                     # fc_v weight (no bias)
        "attn_e": jax.random.normal(ks[4], (1, D), jnp.float32),
        "wagg":   u(ks[5], (D, D)),                     # linear_agg weight
        "bagg":   u(ks[6], (1, D)),                     # linear_agg bias
        "wself":  u(ks[7], (D, D)),                     # linear_self weight (no bias)
        "alpha":  jnp.full((1, D), 0.25, jnp.float32),  # PReLU per-channel slope
    }


if __name__ == "__main__":
    # N=256 so the attention kernel exercises both a multi-step "parallel"
    # dst-tile axis and a 2-step online-softmax src-tile axis (tiles of 128).
    N, D, NUM_LAYERS = 256, 32, 2

    key = jax.random.PRNGKey(0)
    k_ft, k_adj, k_par = jax.random.split(key, 3)

    ft = jax.random.normal(k_ft, (N, D), jnp.float32)

    adjs_f32, adjs_i8 = [], []
    for ak in jax.random.split(k_adj, NUM_LAYERS):
        a = (jax.random.uniform(ak, (N, N)) < 0.1).astype(jnp.float32)
        a = jnp.maximum(a, jnp.eye(N, dtype=jnp.float32))  # self-loops: no empty rows
        adjs_f32.append(a)
        adjs_i8.append(a.astype(jnp.int8))                 # kernel takes int8 adjacency

    layer_params = [init_layer_params(lk, D) for lk in jax.random.split(k_par, NUM_LAYERS)]

    out = kg_embedding_forward(ft, adjs_i8, layer_params)
    out = jax.block_until_ready(out)

    ref = ft
    for adj, p in zip(adjs_f32, layer_params):
        ref = _kg_layer_reference(ref, adj, p)
    ref = jax.block_until_ready(ref)

    assert bool(jnp.all(jnp.isfinite(out)))
    np.testing.assert_allclose(np.asarray(out), np.asarray(ref), rtol=2e-2, atol=2e-2)
    print("KERNEL_OK")
</pallas_src>

<mosaic_0001>
module attributes {stable_mosaic.version = 11 : i64} {
  func.func @_bn_qkv_kernel(%arg0: i32, %arg1: memref<256x32xf32, #tpu.memory_space<vmem>>, %arg2: memref<1x32xf32, #tpu.memory_space<vmem>>, %arg3: memref<1x32xf32, #tpu.memory_space<vmem>>, %arg4: memref<96x32xf32, #tpu.memory_space<vmem>>, %arg5: memref<1x96xf32, #tpu.memory_space<vmem>>, %arg6: memref<256x32xf32, #tpu.memory_space<vmem>>, %arg7: memref<256x32xf32, #tpu.memory_space<vmem>>, %arg8: memref<256x32xf32, #tpu.memory_space<vmem>>, %arg9: memref<256x32xf32, #tpu.memory_space<vmem>>) attributes {dimension_semantics = [#tpu.dimension_semantics<arbitrary>], iteration_bounds = array<i64: 1>, scalar_prefetch = 0 : i64, scratch_operands = 0 : i64, tpu.core_type = #tpu.core_type<tc>, window_params = [{pipeline_mode = #tpu.pipeline_mode<synchronous>, transform_indices = @transform_0, window_bounds = array<i64: 256, 32>}, {pipeline_mode = #tpu.pipeline_mode<synchronous>, transform_indices = @transform_1, window_bounds = array<i64: 1, 32>}, {pipeline_mode = #tpu.pipeline_mode<synchronous>, transform_indices = @transform_2, window_bounds = array<i64: 1, 32>}, {pipeline_mode = #tpu.pipeline_mode<synchronous>, transform_indices = @transform_3, window_bounds = array<i64: 96, 32>}, {pipeline_mode = #tpu.pipeline_mode<synchronous>, transform_indices = @transform_4, window_bounds = array<i64: 1, 96>}, {pipeline_mode = #tpu.pipeline_mode<synchronous>, transform_indices = @transform_5, window_bounds = array<i64: 256, 32>}, {pipeline_mode = #tpu.pipeline_mode<synchronous>, transform_indices = @transform_6, window_bounds = array<i64: 256, 32>}, {pipeline_mode = #tpu.pipeline_mode<synchronous>, transform_indices = @transform_7, window_bounds = array<i64: 256, 32>}, {pipeline_mode = #tpu.pipeline_mode<synchronous>, transform_indices = @transform_8, window_bounds = array<i64: 256, 32>}]} {
    %c0 = arith.constant 0 : index
    %c0_0 = arith.constant 0 : index
    %0 = vector.load %arg1[%c0, %c0_0] : memref<256x32xf32, #tpu.memory_space<vmem>>, vector<256x32xf32>
    %cst = arith.constant dense<0.000000e+00> : vector<32xf32>
    %1 = vector.multi_reduction <add>, %0, %cst [0] : vector<256x32xf32> to vector<32xf32>
    %2 = vector.shape_cast %1 : vector<32xf32> to vector<1x32xf32>
    %cst_1 = arith.constant 2.560000e+02 : f32
    %3 = vector.broadcast %cst_1 : f32 to vector<1x32xf32>
    %4 = arith.divf %2, %3 : vector<1x32xf32>
    %5 = vector.broadcast %4 : vector<1x32xf32> to vector<256x32xf32>
    %6 = arith.subf %0, %5 : vector<256x32xf32>
    %7 = arith.mulf %6, %6 : vector<256x32xf32>
    %cst_2 = arith.constant dense<0.000000e+00> : vector<32xf32>
    %8 = vector.multi_reduction <add>, %7, %cst_2 [0] : vector<256x32xf32> to vector<32xf32>
    %9 = vector.shape_cast %8 : vector<32xf32> to vector<1x32xf32>
    %cst_3 = arith.constant 2.560000e+02 : f32
    %10 = vector.broadcast %cst_3 : f32 to vector<1x32xf32>
    %11 = arith.divf %9, %10 : vector<1x32xf32>
    %c0_4 = arith.constant 0 : index
    %c0_5 = arith.constant 0 : index
    %12 = vector.load %arg2[%c0_4, %c0_5] : memref<1x32xf32, #tpu.memory_space<vmem>>, vector<1x32xf32>
    %13 = vector.broadcast %4 : vector<1x32xf32> to vector<256x32xf32>
    %14 = arith.subf %0, %13 : vector<256x32xf32>
    %15 = vector.broadcast %12 : vector<1x32xf32> to vector<256x32xf32>
    %16 = arith.mulf %15, %14 : vector<256x32xf32>
    %cst_6 = arith.constant 9.99999974E-6 : f32
    %17 = vector.broadcast %cst_6 : f32 to vector<1x32xf32>
    %18 = arith.addf %11, %17 : vector<1x32xf32>
    %19 = math.rsqrt %18 : vector<1x32xf32>
    %20 = vector.broadcast %19 : vector<1x32xf32> to vector<256x32xf32>
    %21 = arith.mulf %16, %20 : vector<256x32xf32>
    %c0_7 = arith.constant 0 : index
    %c0_8 = arith.constant 0 : index
    %22 = vector.load %arg3[%c0_7, %c0_8] : memref<1x32xf32, #tpu.memory_space<vmem>>, vector<1x32xf32>
    %23 = vector.broadcast %22 : vector<1x32xf32> to vector<256x32xf32>
    %24 = arith.addf %21, %23 : vector<256x32xf32>
    %c0_9 = arith.constant 0 : index
    %c0_10 = arith.constant 0 : index
    %25 = vector.load %arg6[%c0_9, %c0_10] : memref<256x32xf32, #tpu.memory_space<vmem>>, vector<256x32xf32>
    tpu.vector_store %arg6[%c0_9, %c0_10], %24 {strides = array<i32>} : memref<256x32xf32, #tpu.memory_space<vmem>>, vector<256x32xf32>,
    %c0_11 = arith.constant 0 : index
    %c0_12 = arith.constant 0 : index
    %26 = vector.load %arg4[%c0_11, %c0_12] : memref<96x32xf32, #tpu.memory_space<vmem>>, vector<96x32xf32>
    %27 = tpu.transpose %26, [1, 0] : vector<96x32xf32> -> vector<32x96xf32>
    %cst_13 = arith.constant dense<0.000000e+00> : vector<256x96xf32>
    %28 = tpu.matmul %24, %27, %cst_13 {dimension_numbers = #tpu.dot_dimension_numbers<[1], [0], [0], [1], [0, 0, 1, 1], [], []>} : vector<256x32xf32>, vector<32x96xf32>, vector<256x96xf32> -> vector<256x96xf32>
    %c0_14 = arith.constant 0 : index
    %c0_15 = arith.constant 0 : index
    %29 = vector.load %arg5[%c0_14, %c0_15] : memref<1x96xf32, #tpu.memory_space<vmem>>, vector<1x96xf32>
    %30 = vector.broadcast %29 : vector<1x96xf32> to vector<256x96xf32>
    %31 = arith.addf %28, %30 : vector<256x96xf32>
    %32 = vector.extract_strided_slice %31 {offsets = [0, 0], sizes = [256, 32], strides = [1, 1]} : vector<256x96xf32> to vector<256x32xf32>
    %c0_16 = arith.constant 0 : index
    %c0_17 = arith.constant 0 : index
    %33 = vector.load %arg7[%c0_16, %c0_17] : memref<256x32xf32, #tpu.memory_space<vmem>>, vector<256x32xf32>
    tpu.vector_store %arg7[%c0_16, %c0_17], %32 {strides = array<i32>} : memref<256x32xf32, #tpu.memory_space<vmem>>, vector<256x32xf32>,
    %34 = vector.extract_strided_slice %31 {offsets = [0, 32], sizes = [256, 32], strides = [1, 1]} : vector<256x96xf32> to vector<256x32xf32>
    %c0_18 = arith.constant 0 : index
    %c0_19 = arith.constant 0 : index
    %35 = vector.load %arg8[%c0_18, %c0_19] : memref<256x32xf32, #tpu.memory_space<vmem>>, vector<256x32xf32>
    tpu.vector_store %arg8[%c0_18, %c0_19], %34 {strides = array<i32>} : memref<256x32xf32, #tpu.memory_space<vmem>>, vector<256x32xf32>,
    %36 = vector.extract_strided_slice %31 {offsets = [0, 64], sizes = [256, 32], strides = [1, 1]} : vector<256x96xf32> to vector<256x32xf32>
    %c0_20 = arith.constant 0 : index
    %c0_21 = arith.constant 0 : index
    %37 = vector.load %arg9[%c0_20, %c0_21] : memref<256x32xf32, #tpu.memory_space<vmem>>, vector<256x32xf32>
    tpu.vector_store %arg9[%c0_20, %c0_21], %36 {strides = array<i32>} : memref<256x32xf32, #tpu.memory_space<vmem>>, vector<256x32xf32>,
    return
  }
  func.func @transform_0(%arg0: i32) -> (i32, i32) {
    %c0_i32 = arith.constant 0 : i32
    %c0_i32_0 = arith.constant 0 : i32
    %c0_i32_1 = arith.constant 0 : i32
    return %c0_i32, %c0_i32_0 : i32, i32
  }
  func.func @transform_1(%arg0: i32) -> (i32, i32) {
    %c0_i32 = arith.constant 0 : i32
    %c0_i32_0 = arith.constant 0 : i32
    %c0_i32_1 = arith.constant 0 : i32
    return %c0_i32, %c0_i32_0 : i32, i32
  }
  func.func @transform_2(%arg0: i32) -> (i32, i32) {
    %c0_i32 = arith.constant 0 : i32
    %c0_i32_0 = arith.constant 0 : i32
    %c0_i32_1 = arith.constant 0 : i32
    return %c0_i32, %c0_i32_0 : i32, i32
  }
  func.func @transform_3(%arg0: i32) -> (i32, i32) {
    %c0_i32 = arith.constant 0 : i32
    %c0_i32_0 = arith.constant 0 : i32
    %c0_i32_1 = arith.constant 0 : i32
    return %c0_i32, %c0_i32_0 : i32, i32
  }
  func.func @transform_4(%arg0: i32) -> (i32, i32) {
    %c0_i32 = arith.constant 0 : i32
    %c0_i32_0 = arith.constant 0 : i32
    %c0_i32_1 = arith.constant 0 : i32
    return %c0_i32, %c0_i32_0 : i32, i32
  }
  func.func @transform_5(%arg0: i32) -> (i32, i32) {
    %c0_i32 = arith.constant 0 : i32
    %c0_i32_0 = arith.constant 0 : i32
    %c0_i32_1 = arith.constant 0 : i32
    return %c0_i32, %c0_i32_0 : i32, i32
  }
  func.func @transform_6(%arg0: i32) -> (i32, i32) {
    %c0_i32 = arith.constant 0 : i32
    %c0_i32_0 = arith.constant 0 : i32
    %c0_i32_1 = arith.constant 0 : i32
    return %c0_i32, %c0_i32_0 : i32, i32
  }
  func.func @transform_7(%arg0: i32) -> (i32, i32) {
    %c0_i32 = arith.constant 0 : i32
    %c0_i32_0 = arith.constant 0 : i32
    %c0_i32_1 = arith.constant 0 : i32
    return %c0_i32, %c0_i32_0 : i32, i32
  }
  func.func @transform_8(%arg0: i32) -> (i32, i32) {
    %c0_i32 = arith.constant 0 : i32
    %c0_i32_0 = arith.constant 0 : i32
    %c0_i32_1 = arith.constant 0 : i32
    return %c0_i32, %c0_i32_0 : i32, i32
  }
}

</mosaic_0001>

<bundles_post_ra>
// kernel: tpu_custom_call.1
= control target key start
LH: loop header
LB: loop body
LE: loop exit
PB: predicated region body
PF: predicated region fallthrough
CT: control target
= control target key end

     0   :  { %vm56_vm0 = vcmask 261120   ;;  %s1310_s25 = smov 64   ;;  %s2785_s3 = inlined_call_operand.vmem [shape: f32[96,32], index: 3, kind: input, shape index: {}]   ;;  %s2786_s0 = inlined_call_operand.vmem [shape: f32[256,32], index: 0, kind: input, shape index: {}]   ;;  %s2787_s1 = inlined_call_operand.vmem [shape: f32[1,32], index: 1, kind: input, shape index: {}]   ;;  %s2788_s2 = inlined_call_operand.vmem [shape: f32[1,32], index: 2, kind: input, shape index: {}]   ;;  %s2789_s5 = inlined_call_operand.vmem [shape: f32[256,32], index: 5, kind: output, shape index: {0}]   ;;  %s2790_s4 = inlined_call_operand.vmem [shape: f32[1,96], index: 4, kind: input, shape index: {}]   ;;  %s2791_s6 = inlined_call_operand.vmem [shape: f32[256,32], index: 6, kind: output, shape index: {1}]   ;;  %s2792_s7 = inlined_call_operand.vmem [shape: f32[256,32], index: 7, kind: output, shape index: {2}]   ;;  %s2793_s8 = inlined_call_operand.vmem [shape: f32[256,32], index: 8, kind: output, shape index: {3}]  }
   0x1   :  { %v417_v0 = vld [vmem:[%s2785_s3 + $0x58] sm:$0xff]  ;;  %v416_v1 = vld [vmem:[%s2785_s3 + $0x50] sm:$0xff]  ;;  %v415_v2 = vld [vmem:[%s2785_s3 + $0x48] sm:$0xff] }
   0x2   :  { %1209 = vmatprep.subr.msk.mxu0 %vm56_vm0, %v417_v0  ;;  %1281 = vmatprep.subr.msk.mxu1 %vm56_vm0, %v417_v0  ;;  %v1374_v3 = vld [vmem:[%s2786_s0] sm:$0xff]  ;;  %v1379_v4 = vld [vmem:[%s2786_s0 + $0x8] sm:$0xff]  ;;  %v1384_v5 = vld [vmem:[%s2786_s0 + $0x10] sm:$0xff] }
   0x3   :  { %1210 = vmatpush3.xpose.msk.msra.mxu0 %vm56_vm0, %v417_v0  ;;  %1293 = vmatpush3.xpose.msk.msra.mxu1 %vm56_vm0, %v417_v0  ;;  %v1389_v6 = vld [vmem:[%s2786_s0 + $0x18] sm:$0xff]  ;;  %v57_v7 = vsel %vm56_vm0, %v1374_v3, 0.0  ;;  %v58_v8 = vsel %vm56_vm0, %v1379_v4, 0.0  ;;  %v60_v9 = vsel %vm56_vm0, %v1384_v5, 0.0  ;;  %v1402_v10 = vld [vmem:[%s2786_s0 + $0x20] sm:$0xff]  ;;  %v1414_v14 = vld [vmem:[%s2786_s0 + $0x28] sm:$0xff] }
   0x4   :  { %1211 = vmatprep.subr.msk.mxu0 %vm56_vm0, %v416_v1  ;;  %1282 = vmatprep.subr.msk.mxu1 %vm56_vm0, %v416_v1  ;;  %v59_v11 = vadd.f32 %v58_v8, %v57_v7  ;;  %v62_v12 = vsel %vm56_vm0, %v1389_v6, 0.0  ;;  %v414_v13 = vld [vmem:[%s2785_s3 + $0x40] sm:$0xff]  ;;  %v64_v16 = vsel %vm56_vm0, %v1402_v10, 0.0  ;;  %v1423_v17 = vld [vmem:[%s2786_s0 + $0x30] sm:$0xff]  ;;  %v66_v19 = vsel %vm56_vm0, %v1414_v14, 0.0  ;;  %v413_v20 = vld [vmem:[%s2785_s3 + $0x38] sm:$0xff] }
   0x5   :  { %v1435_v21 = vld [vmem:[%s2786_s0 + $0x38] sm:$0xff]  ;;  %v68_v23 = vsel %vm56_vm0, %v1423_v17, 0.0  ;;  %v1444_v24 = vld [vmem:[%s2786_s0 + $0x40] sm:$0xff]  ;;  %v412_v27 = vld [vmem:[%s2785_s3 + $0x30] sm:$0xff] }
   0x6   :  { %v61_v15 = vadd.f32 %v60_v9, %v59_v11  ;;  %v70_v26 = vsel %vm56_vm0, %v1435_v21, 0.0  ;;  %v1456_v28 = vld [vmem:[%s2786_s0 + $0x48] sm:$0xff]  ;;  %v72_v30 = vsel %vm56_vm0, %v1444_v24, 0.0  ;;  %v1465_v31 = vld [vmem:[%s2786_s0 + $0x50] sm:$0xff]  ;;  %v1477_v35 = vld [vmem:[%s2786_s0 + $0x58] sm:$0xff] }
   0x7   :  { %1212 = vmatpush3.xpose.msk.msra.mxu0 %vm56_vm0, %v416_v1  ;;  %1294 = vmatpush3.xpose.msk.msra.mxu1 %vm56_vm0, %v416_v1  ;;  %v74_v33 = vsel %vm56_vm0, %v1456_v28, 0.0  ;;  %v411_v34 = vld [vmem:[%s2785_s3 + $0x28] sm:$0xff]  ;;  %v76_v37 = vsel %vm56_vm0, %v1465_v31, 0.0  ;;  %v1486_v38 = vld [vmem:[%s2786_s0 + $0x60] sm:$0xff]  ;;  %v78_v40 = vsel %vm56_vm0, %v1477_v35, 0.0  ;;  %v1507_v45 = vld [vmem:[%s2786_s0 + $0x70] sm:$0xff] }
   0x8   :  { %1213 = vmatprep.subr.msk.mxu0 %vm56_vm0, %v415_v2  ;;  %1283 = vmatprep.subr.msk.mxu1 %vm56_vm0, %v415_v2  ;;  %v63_v18 = vadd.f32 %v62_v12, %v61_v15  ;;  %v410_v41 = vld [vmem:[%s2785_s3 + $0x20] sm:$0xff]  ;;  %v1498_v42 = vld [vmem:[%s2786_s0 + $0x68] sm:$0xff]  ;;  %v80_v44 = vsel %vm56_vm0, %v1486_v38, 0.0  ;;  %v409_v48 = vld [vmem:[%s2785_s3 + $0x18] sm:$0xff]  ;;  %v84_v51 = vsel %vm56_vm0, %v1507_v45, 0.0 }
   0x9   :  { %v82_v47 = vsel %vm56_vm0, %v1498_v42, 0.0  ;;  %v1519_v49 = vld [vmem:[%s2786_s0 + $0x78] sm:$0xff]  ;;  %v1528_v52 = vld [vmem:[%s2786_s0 + $0x80] sm:$0xff]  ;;  %v408_v55 = vld [vmem:[%s2785_s3 + $0x10] sm:$0xff] }
   0xa   :  { %v65_v22 = vadd.f32 %v64_v16, %v63_v18  ;;  %v86_v54 = vsel %vm56_vm0, %v1519_v49, 0.0  ;;  %v1540_v56 = vld [vmem:[%s2786_s0 + $0x88] sm:$0xff]  ;;  %v88_v58 = vsel %vm56_vm0, %v1528_v52, 0.0  ;;  %v1549_v59 = vld [vmem:[%s2786_s0 + $0x90] sm:$0xff]  ;;  %v1561_v63 = vld [vmem:[%s2786_s0 + $0x98] sm:$0xff] }
   0xb   :  { %1214 = vmatpush3.xpose.msk.msra.mxu0 %vm56_vm0, %v415_v2  ;;  %1295 = vmatpush3.xpose.msk.msra.mxu1 %vm56_vm0, %v415_v2  ;;  %v90_v61 = vsel %vm56_vm0, %v1540_v56, 0.0  ;;  %v407_v62 = vld [vmem:[%s2785_s3 + $0x8] sm:$0xff]  ;;  %v92_v1 = vsel %vm56_vm0, %v1549_v59, 0.0  ;;  %v1570_v2 = vld [vmem:[%s2786_s0 + $0xa0] sm:$0xff]  ;;  %v94_v8 = vsel %vm56_vm0, %v1561_v63, 0.0  ;;  %v1591_v15 = vld [vmem:[%s2786_s0 + $0xb0] sm:$0xff] }
   0xc   :  { %1215 = vmatprep.subr.msk.mxu0 %vm56_vm0, %v414_v13  ;;  %1284 = vmatprep.subr.msk.mxu1 %vm56_vm0, %v414_v13  ;;  %v67_v25 = vadd.f32 %v66_v19, %v65_v22  ;;  %v406_v9 = vld [vmem:[%s2785_s3] sm:$0xff]  ;;  %v1582_v11 = vld [vmem:[%s2786_s0 + $0xa8] sm:$0xff]  ;;  %v1600_v19 = vld [vmem:[%s2786_s0 + $0xb8] sm:$0xff]  ;;  %v100_v22 = vsel %vm56_vm0, %v1591_v15, 0.0 }
   0xd   :  { %v98_v18 = vsel %vm56_vm0, %v1582_v11, 0.0 }
   0xe   :  { %v69_v29 = vadd.f32 %v68_v23, %v67_v25  ;;  %v1609_v23 = vld [vmem:[%s2786_s0 + $0xc0] sm:$0xff] }
   0xf   :  { %1216 = vmatpush3.xpose.msk.msra.mxu0 %vm56_vm0, %v414_v13  ;;  %1296 = vmatpush3.xpose.msk.msra.mxu1 %vm56_vm0, %v414_v13  ;;  %v96_v13 = vsel %vm56_vm0, %v1570_v2, 0.0 }
  0x10   :  { %1217 = vmatprep.subr.msk.mxu0 %vm56_vm0, %v413_v20  ;;  %1285 = vmatprep.subr.msk.mxu1 %vm56_vm0, %v413_v20  ;;  %v71_v32 = vadd.f32 %v70_v26, %v69_v29  ;;  %v102_v26 = vsel %vm56_vm0, %v1600_v19, 0.0 }
  0x12   :  { %v73_v36 = vadd.f32 %v72_v30, %v71_v32  ;;  %v104_v30 = vsel %vm56_vm0, %v1609_v23, 0.0  ;;  %v1623_v32 = vld [vmem:[%s2786_s0 + $0xd0] sm:$0xff] }
  0x13   :  { %1218 = vmatpush3.xpose.msk.msra.mxu0 %vm56_vm0, %v413_v20  ;;  %1297 = vmatpush3.xpose.msk.msra.mxu1 %vm56_vm0, %v413_v20 }
  0x14   :  { %1219 = vmatprep.subr.msk.mxu0 %vm56_vm0, %v412_v27  ;;  %1286 = vmatprep.subr.msk.mxu1 %vm56_vm0, %v412_v27  ;;  %v75_v39 = vadd.f32 %v74_v33, %v73_v36  ;;  %v1630_v36 = vld [vmem:[%s2786_s0 + $0xd8] sm:$0xff] }
  0x16   :  { %v77_v43 = vadd.f32 %v76_v37, %v75_v39  ;;  %v108_v39 = vsel %vm56_vm0, %v1623_v32, 0.0 }
  0x17   :  { %1220 = vmatpush3.xpose.msk.msra.mxu0 %vm56_vm0, %v412_v27  ;;  %1298 = vmatpush3.xpose.msk.msra.mxu1 %vm56_vm0, %v412_v27  ;;  %v1616_v27 = vld [vmem:[%s2786_s0 + $0xc8] sm:$0xff] }
  0x18   :  { %1221 = vmatprep.subr.msk.mxu0 %vm56_vm0, %v411_v34  ;;  %1287 = vmatprep.subr.msk.mxu1 %vm56_vm0, %v411_v34  ;;  %v79_v46 = vadd.f32 %v78_v40, %v77_v43  ;;  %v1637_v40 = vld [vmem:[%s2786_s0 + $0xe0] sm:$0xff]  ;;  %v110_v43 = vsel %vm56_vm0, %v1630_v36, 0.0 }
  0x1a   :  { %v81_v50 = vadd.f32 %v80_v44, %v79_v46  ;;  %v1644_v44 = vld [vmem:[%s2786_s0 + $0xe8] sm:$0xff] }
  0x1b   :  { %1222 = vmatpush3.xpose.msk.msra.mxu0 %vm56_vm0, %v411_v34  ;;  %1299 = vmatpush3.xpose.msk.msra.mxu1 %vm56_vm0, %v411_v34  ;;  %v106_v34 = vsel %vm56_vm0, %v1616_v27, 0.0 }
  0x1c   :  { %1223 = vmatprep.subr.msk.mxu0 %vm56_vm0, %v410_v41  ;;  %1288 = vmatprep.subr.msk.mxu1 %vm56_vm0, %v410_v41  ;;  %v83_v53 = vadd.f32 %v82_v47, %v81_v50  ;;  %v112_v47 = vsel %vm56_vm0, %v1637_v40, 0.0 }
  0x1e   :  { %v85_v57 = vadd.f32 %v84_v51, %v83_v53  ;;  %v114_v51 = vsel %vm56_vm0, %v1644_v44, 0.0  ;;  %v1658_v53 = vld [vmem:[%s2786_s0 + $0xf8] sm:$0xff] }
  0x1f   :  { %1224 = vmatpush3.xpose.msk.msra.mxu0 %vm56_vm0, %v410_v41  ;;  %1300 = vmatpush3.xpose.msk.msra.mxu1 %vm56_vm0, %v410_v41 }
  0x20   :  { %1225 = vmatprep.subr.msk.mxu0 %vm56_vm0, %v409_v48  ;;  %1289 = vmatprep.subr.msk.mxu1 %vm56_vm0, %v409_v48  ;;  %v87_v60 = vadd.f32 %v86_v54, %v85_v57 }
  0x22   :  { %v89_v0 = vadd.f32 %v88_v58, %v87_v60  ;;  %v118_v58 = vsel %vm56_vm0, %v1658_v53, 0.0 }
  0x23   :  { %1226 = vmatpush3.xpose.msk.msra.mxu0 %vm56_vm0, %v409_v48  ;;  %1301 = vmatpush3.xpose.msk.msra.mxu1 %vm56_vm0, %v409_v48  ;;  %v1651_v48 = vld [vmem:[%s2786_s0 + $0xf0] sm:$0xff] }
  0x24   :  { %1227 = vmatprep.subr.msk.mxu0 %vm56_vm0, %v408_v55  ;;  %1290 = vmatprep.subr.msk.mxu1 %vm56_vm0, %v408_v55  ;;  %v91_v7 = vadd.f32 %v90_v61, %v89_v0 }
  0x26   :  { %v93_v12 = vadd.f32 %v92_v1, %v91_v7 }
  0x27   :  { %1228 = vmatpush3.xpose.msk.msra.mxu0 %vm56_vm0, %v408_v55  ;;  %1302 = vmatpush3.xpose.msk.msra.mxu1 %vm56_vm0, %v408_v55  ;;  %v116_v55 = vsel %vm56_vm0, %v1651_v48, 0.0 }
  0x28   :  { %1229 = vmatprep.subr.msk.mxu0 %vm56_vm0, %v407_v62  ;;  %1291 = vmatprep.subr.msk.mxu1 %vm56_vm0, %v407_v62  ;;  %v95_v16 = vadd.f32 %v94_v8, %v93_v12 }
  0x2a   :  { %v97_v20 = vadd.f32 %v96_v13, %v95_v16 }
  0x2b   :  { %1230 = vmatpush3.xpose.msk.msra.mxu0 %vm56_vm0, %v407_v62  ;;  %1303 = vmatpush3.xpose.msk.msra.mxu1 %vm56_vm0, %v407_v62 }
  0x2c   :  { %1231 = vmatprep.subr.msk.mxu0 %vm56_vm0, %v406_v9  ;;  %1292 = vmatprep.subr.msk.mxu1 %vm56_vm0, %v406_v9  ;;  %v99_v25 = vadd.f32 %v98_v18, %v97_v20 }
  0x2e   :  { %v101_v29 = vadd.f32 %v100_v22, %v99_v25 }
  0x2f   :  { %1232 = vmatpush3.xpose.msk.msra.mxu0 %vm56_vm0, %v406_v9  ;;  %1304 = vmatpush3.xpose.msk.msra.mxu1 %vm56_vm0, %v406_v9 }
  0x30   :  { %v103_v33 = vadd.f32 %v102_v26, %v101_v29 }
  0x32   :  { %v105_v37 = vadd.f32 %v104_v30, %v103_v33 }
  0x34   :  { %v107_v41 = vadd.f32 %v106_v34, %v105_v37 }
  0x36   :  { %v109_v46 = vadd.f32 %v108_v39, %v107_v41 }
  0x38   :  { %v111_v50 = vadd.f32 %v110_v43, %v109_v46 }
  0x3a   :  { %v113_v54 = vadd.f32 %v112_v47, %v111_v50 }
  0x3c   :  { %v115_v57 = vadd.f32 %v114_v51, %v113_v54 }
  0x3e   :  { %v117_v60 = vadd.f32 %v116_v55, %v115_v57 }
  0x40   :  { %v119_v61 = vadd.f32 %v118_v58, %v117_v60 }
  0x42   :  { %v120_v62 = vrot.slane %v119_v61, 4 }
  0x44   :  { %v121_v0 = vadd.f32 %v120_v62, %v119_v61 }
  0x46   :  { %v122_v1 = vrot.slane %v121_v0, 2 }
  0x48   :  { %v123_v7 = vadd.f32 %v122_v1, %v121_v0 }
  0x4a   :  { %v124_v8 = vrot.slane %v123_v7, 1 }
  0x4c   :  { %v125_v9 = vadd.f32 %v124_v8, %v123_v7 }
  0x4e   :  { %v1664_v12 = vmul.f32 0.00390625, %v125_v9 }
  0x50   :  { %v1668_v13 = vsub.f32 %v1374_v3, %v1664_v12  ;;  %v1672_v16 = vsub.f32 %v1379_v4, %v1664_v12  ;;  %v1676_v18 = vsub.f32 %v1384_v5, %v1664_v12  ;;  %v1680_v20 = vsub.f32 %v1389_v6, %v1664_v12 }
  0x51   :  { %v1684_v22 = vsub.f32 %v1402_v10, %v1664_v12  ;;  %v1694_v5 = vsub.f32 %v1414_v14, %v1664_v12  ;;  %v1700_v10 = vsub.f32 %v1423_v17, %v1664_v12  ;;  %v1709_v14 = vsub.f32 %v1435_v21, %v1664_v12 }
  0x52   :  { %v160_v3 = vmul.f32 %v1668_v13, %v1668_v13  ;;  %v161_v25 = vmul.f32 %v1672_v16, %v1672_v16  ;;  %v162_v4 = vmul.f32 %v1676_v18, %v1676_v18  ;;  %v163_v6 = vmul.f32 %v1680_v20, %v1680_v20 }
  0x53   :  { %v164_v26 = vmul.f32 %v1684_v22, %v1684_v22  ;;  %v165_v37 = vmul.f32 %v1694_v5, %v1694_v5  ;;  %v1716_v41 = vsub.f32 %v1444_v24, %v1664_v12  ;;  %v166_v43 = vmul.f32 %v1700_v10, %v1700_v10 }
  0x54   :  { %v192_v29 = vsel %vm56_vm0, %v160_v3, 0.0  ;;  %v193_v30 = vsel %vm56_vm0, %v161_v25, 0.0  ;;  %v195_v33 = vsel %vm56_vm0, %v162_v4, 0.0  ;;  %v197_v17 = vsel %vm56_vm0, %v163_v6, 0.0 }
  0x55   :  { %v194_v34 = vadd.f32 %v193_v30, %v192_v29  ;;  %v199_v46 = vsel %vm56_vm0, %v164_v26, 0.0  ;;  %v1723_v21 = vsub.f32 %v1456_v28, %v1664_v12  ;;  %v167_v50 = vmul.f32 %v1709_v14, %v1709_v14 }
  0x56   :  { %v201_v51 = vsel %vm56_vm0, %v165_v37, 0.0  ;;  %v1730_v24 = vsub.f32 %v1465_v31, %v1664_v12  ;;  %v168_v55 = vmul.f32 %v1716_v41, %v1716_v41  ;;  %v203_v57 = vsel %vm56_vm0, %v166_v43, 0.0 }
  0x57   :  { %v196_v39 = vadd.f32 %v195_v33, %v194_v34  ;;  %v1737_v28 = vsub.f32 %v1477_v35, %v1664_v12  ;;  %v169_v60 = vmul.f32 %v1723_v21, %v1723_v21  ;;  %v205_v61 = vsel %vm56_vm0, %v167_v50, 0.0 }
  0x58   :  { %v1744_v31 = vsub.f32 %v1486_v38, %v1664_v12  ;;  %v170_v0 = vmul.f32 %v1730_v24, %v1730_v24  ;;  %v207_v1 = vsel %vm56_vm0, %v168_v55, 0.0  ;;  %v1751_v35 = vsub.f32 %v1498_v42, %v1664_v12 }
  0x59   :  { %v198_v47 = vadd.f32 %v197_v17, %v196_v39  ;;  %v171_v8 = vmul.f32 %v1737_v28, %v1737_v28  ;;  %v209_v9 = vsel %vm56_vm0, %v169_v60, 0.0  ;;  %v1758_v38 = vsub.f32 %v1507_v45, %v1664_v12 }
  0x5a   :  { %v172_v25 = vmul.f32 %v1744_v31, %v1744_v31  ;;  %v211_v4 = vsel %vm56_vm0, %v170_v0, 0.0  ;;  %v1765_v42 = vsub.f32 %v1519_v49, %v1664_v12  ;;  %v173_v26 = vmul.f32 %v1751_v35, %v1751_v35 }
  0x5b   :  { %v200_v54 = vadd.f32 %v199_v46, %v198_v47  ;;  %v213_v29 = vsel %vm56_vm0, %v171_v8, 0.0  ;;  %v1772_v45 = vsub.f32 %v1528_v52, %v1664_v12  ;;  %v174_v33 = vmul.f32 %v1758_v38, %v1758_v38 }
  0x5c   :  { %v215_v34 = vsel %vm56_vm0, %v172_v25, 0.0  ;;  %v1779_v49 = vsub.f32 %v1540_v56, %v1664_v12  ;;  %v175_v17 = vmul.f32 %v1765_v42, %v1765_v42  ;;  %v217_v39 = vsel %vm56_vm0, %v173_v26, 0.0 }
  0x5d   :  { %v202_v58 = vadd.f32 %v201_v51, %v200_v54  ;;  %v1786_v52 = vsub.f32 %v1549_v59, %v1664_v12  ;;  %v176_v46 = vmul.f32 %v1772_v45, %v1772_v45  ;;  %v219_v47 = vsel %vm56_vm0, %v174_v33, 0.0 }
  0x5e   :  { %v1793_v56 = vsub.f32 %v1561_v63, %v1664_v12  ;;  %v177_v51 = vmul.f32 %v1779_v49, %v1779_v49  ;;  %v221_v54 = vsel %vm56_vm0, %v175_v17, 0.0  ;;  %v1800_v59 = vsub.f32 %v1570_v2, %v1664_v12 }
  0x5f   :  { %v204_v62 = vadd.f32 %v203_v57, %v202_v58  ;;  %v178_v57 = vmul.f32 %v1786_v52, %v1786_v52  ;;  %v223_v58 = vsel %vm56_vm0, %v176_v46, 0.0  ;;  %v1807_v63 = vsub.f32 %v1582_v11, %v1664_v12 }
  0x60   :  { %v1814_v2 = vsub.f32 %v1591_v15, %v1664_v12  ;;  %v1821_v11 = vsub.f32 %v1600_v19, %v1664_v12  ;;  %v1828_v15 = vsub.f32 %v1609_v23, %v1664_v12  ;;  %v1835_v19 = vsub.f32 %v1616_v27, %v1664_v12 }
  0x61   :  { %v206_v7 = vadd.f32 %v205_v61, %v204_v62  ;;  %v179_v61 = vmul.f32 %v1793_v56, %v1793_v56  ;;  %v225_v62 = vsel %vm56_vm0, %v177_v51, 0.0  ;;  %v1842_v23 = vsub.f32 %v1623_v32, %v1664_v12 }
  0x62   :  { %v1849_v27 = vsub.f32 %v1630_v36, %v1664_v12  ;;  %v1856_v32 = vsub.f32 %v1637_v40, %v1664_v12  ;;  %v157_v36 = vsub.f32 %v1644_v44, %v1664_v12 }
  0x63   :  { %v208_v3 = vadd.f32 %v207_v1, %v206_v7  ;;  %v180_v1 = vmul.f32 %v1800_v59, %v1800_v59  ;;  %v227_v7 = vsel %vm56_vm0, %v178_v57, 0.0 }
  0x64   :  { %v188_v40 = vmul.f32 %v1856_v32, %v1856_v32  ;;  %v189_v44 = vmul.f32 %v157_v36, %v157_v36 }
  0x65   :  { %v210_v6 = vadd.f32 %v209_v9, %v208_v3  ;;  %v181_v9 = vmul.f32 %v1807_v63, %v1807_v63  ;;  %v229_v3 = vsel %vm56_vm0, %v179_v61, 0.0 }
  0x67   :  { %v212_v30 = vadd.f32 %v211_v4, %v210_v6  ;;  %v182_v4 = vmul.f32 %v1814_v2, %v1814_v2  ;;  %v231_v6 = vsel %vm56_vm0, %v180_v1, 0.0 }
  0x69   :  { %v214_v37 = vadd.f32 %v213_v29, %v212_v30  ;;  %v183_v29 = vmul.f32 %v1821_v11, %v1821_v11  ;;  %v233_v30 = vsel %vm56_vm0, %v181_v9, 0.0 }
  0x6b   :  { %v216_v43 = vadd.f32 %v215_v34, %v214_v37  ;;  %v184_v34 = vmul.f32 %v1828_v15, %v1828_v15  ;;  %v235_v37 = vsel %vm56_vm0, %v182_v4, 0.0 }
  0x6d   :  { %v218_v50 = vadd.f32 %v217_v39, %v216_v43  ;;  %v185_v39 = vmul.f32 %v1835_v19, %v1835_v19  ;;  %v237_v43 = vsel %vm56_vm0, %v183_v29, 0.0 }
  0x6f   :  { %v220_v55 = vadd.f32 %v219_v47, %v218_v50  ;;  %v186_v47 = vmul.f32 %v1842_v23, %v1842_v23  ;;  %v239_v50 = vsel %vm56_vm0, %v184_v34, 0.0 }
  0x71   :  { %v222_v60 = vadd.f32 %v221_v54, %v220_v55  ;;  %v187_v54 = vmul.f32 %v1849_v27, %v1849_v27  ;;  %v241_v55 = vsel %vm56_vm0, %v185_v39, 0.0 }
  0x73   :  { %v224_v0 = vadd.f32 %v223_v58, %v222_v60  ;;  %v1868_v58 = vsub.f32 %v1651_v48, %v1664_v12  ;;  %v243_v60 = vsel %vm56_vm0, %v186_v47, 0.0 }
  0x75   :  { %v226_v8 = vadd.f32 %v225_v62, %v224_v0  ;;  %v159_v62 = vsub.f32 %v1658_v53, %v1664_v12  ;;  %v245_v0 = vsel %vm56_vm0, %v187_v54, 0.0 }
  0x77   :  { %v228_v25 = vadd.f32 %v227_v7, %v226_v8  ;;  %v190_v7 = vmul.f32 %v1868_v58, %v1868_v58  ;;  %v247_v8 = vsel %vm56_vm0, %v188_v40, 0.0  ;;  %v191_v9 = vmul.f32 %v159_v62, %v159_v62 }
  0x79   :  { %v230_v26 = vadd.f32 %v229_v3, %v228_v25  ;;  %v249_v3 = vsel %vm56_vm0, %v189_v44, 0.0  ;;  %v251_v4 = vsel %vm56_vm0, %v190_v7, 0.0 }
  0x7b   :  { %v232_v33 = vadd.f32 %v231_v6, %v230_v26  ;;  %v253_v26 = vsel %vm56_vm0, %v191_v9, 0.0 }
  0x7d   :  { %v234_v17 = vadd.f32 %v233_v30, %v232_v33 }
  0x7f   :  { %v236_v46 = vadd.f32 %v235_v37, %v234_v17 }
  0x81   :  { %v238_v51 = vadd.f32 %v237_v43, %v236_v46  ;;  %v1118_v46 = vld [vmem:[%s2787_s1] ss:$0 sm:$0xff] }
  0x82   :  { %v269_v47 = vmul.f32 %v1118_v46, %v1668_v13  ;;  %v286_v54 = vmul.f32 %v1118_v46, %v1779_v49  ;;  %v287_v40 = vmul.f32 %v1118_v46, %v1786_v52  ;;  %v274_v44 = vmul.f32 %v1118_v46, %v1694_v5 }
  0x83   :  { %v240_v57 = vadd.f32 %v239_v50, %v238_v51  ;;  %v285_v50 = vmul.f32 %v1118_v46, %v1772_v45  ;;  %v270_v51 = vmul.f32 %v1118_v46, %v1672_v16  ;;  %v289_v13 = vmul.f32 %v1118_v46, %v1800_v59 }
  0x84   :  { %v290_v45 = vmul.f32 %v1118_v46, %v1807_v63  ;;  %v275_v16 = vmul.f32 %v1118_v46, %v1700_v10  ;;  %v276_v49 = vmul.f32 %v1118_v46, %v1709_v14  ;;  %v1906_v52 = vmul.f32 %v1118_v46, %v1716_v41 }
  0x85   :  { %v242_v61 = vadd.f32 %v241_v55, %v240_v57  ;;  %v271_v55 = vmul.f32 %v1118_v46, %v1676_v18  ;;  %v272_v57 = vmul.f32 %v1118_v46, %v1680_v20  ;;  %v1900_v18 = vmul.f32 %v1118_v46, %v1814_v2 }
  0x86   :  { %v1903_v20 = vmul.f32 %v1118_v46, %v1821_v11  ;;  %v1912_v5 = vmul.f32 %v1118_v46, %v1828_v15  ;;  %v1918_v10 = vmul.f32 %v1118_v46, %v1730_v24  ;;  %v1921_v14 = vmul.f32 %v1118_v46, %v1737_v28  ;;  %v1945_v28 = vld [vmem:[%s2788_s2] ss:$0 sm:$0xff] }
  0x87   :  { %v244_v1 = vadd.f32 %v243_v60, %v242_v61  ;;  %v288_v60 = vmul.f32 %v1118_v46, %v1793_v56  ;;  %v273_v61 = vmul.f32 %v1118_v46, %v1684_v22  ;;  %v1909_v22 = vmul.f32 %v1118_v46, %v1723_v21 }
  0x88   :  { %v1915_v56 = vmul.f32 %v1118_v46, %v1835_v19  ;;  %v1924_v59 = vmul.f32 %v1118_v46, %v1842_v23  ;;  %v1927_v41 = vmul.f32 %v1118_v46, %v1849_v27  ;;  %v1930_v21 = vmul.f32 %v1118_v46, %v1744_v31 }
  0x89   :  { %v246_v48 = vadd.f32 %v245_v0, %v244_v1  ;;  %v1933_v63 = vmul.f32 %v1118_v46, %v1751_v35  ;;  %v1936_v2 = vmul.f32 %v1118_v46, %v1856_v32  ;;  %v1938_v24 = vmul.f32 %v1118_v46, %v157_v36 }
  0x8a   :  { %v1948_v15 = vmul.f32 %v1118_v46, %v1758_v38  ;;  %v1951_v31 = vmul.f32 %v1118_v46, %v1765_v42  ;;  %v1954_v35 = vmul.f32 %v1118_v46, %v1868_v58  ;;  %v1956_v19 = vmul.f32 %v1118_v46, %v159_v62 }
  0x8b   :  { %v248_v25 = vadd.f32 %v247_v8, %v246_v48 }
  0x8d   :  { %v250_v6 = vadd.f32 %v249_v3, %v248_v25 }
  0x8f   :  { %v252_v53 = vadd.f32 %v251_v4, %v250_v6 }
  0x91   :  { %v254_v12 = vadd.f32 %v253_v26, %v252_v53 }
  0x93   :  { %v255_v29 = vrot.slane %v254_v12, 4 }
  0x95   :  { %v256_v30 = vadd.f32 %v255_v29, %v254_v12 }
  0x97   :  { %v257_v33 = vrot.slane %v256_v30, 2 }
  0x99   :  { %v258_v34 = vadd.f32 %v257_v33, %v256_v30 }
  0x9b   :  { %v259_v37 = vrot.slane %v258_v34, 1 }
  0x9d   :  { %v260_v17 = vadd.f32 %v259_v37, %v258_v34 }
  0x9f   :  { %v261_v39 = vmul.f32 0.00390625, %v260_v17 }
  0xa1   :  { %v301_v43 = vadd.f32 1e-05, %v261_v39 }
  0xa3   :  { %1307 = vrsqrt.f32 %v301_v43 }
  0xb0   :  { %v1940_v11 = vpop.eup %1307 }
  0xb1   :  { %v303_v23 = vmul.f32 %v1940_v11, %v269_v47  ;;  %v319_v27 = vmul.f32 %v1940_v11, %v285_v50  ;;  %v304_v32 = vmul.f32 %v1940_v11, %v270_v51  ;;  %v320_v36 = vmul.f32 %v1940_v11, %v286_v54 }
  0xb2   :  { %v305_v0 = vmul.f32 %v1940_v11, %v271_v55  ;;  %v306_v38 = vmul.f32 %v1940_v11, %v272_v57  ;;  %v321_v42 = vmul.f32 %v1940_v11, %v287_v40  ;;  %v322_v1 = vmul.f32 %v1940_v11, %v288_v60 }
  0xb3   :  { %v342_v58 = vadd.f32 %v1945_v28, %v303_v23  ;;  %v358_v62 = vadd.f32 %v1945_v28, %v319_v27  ;;  %v343_v7 = vadd.f32 %v1945_v28, %v304_v32  ;;  %v359_v8 = vadd.f32 %v1945_v28, %v320_v36 }
  0xb4   :  { %v344_v48 = vadd.f32 %v1945_v28, %v305_v0  ;;  %v345_v9 = vadd.f32 %v1945_v28, %v306_v38  ;;  %v360_v3 = vadd.f32 %v1945_v28, %v321_v42  ;;  %v361_v25 = vadd.f32 %v1945_v28, %v322_v1 }
  0xb5   :  { %374 = vst.msk [vmem:[%s2789_s5] sm:$0xff] %vm56_vm0, %v342_v58  ;;  %1233 = vmatprep.mubr.msk.f32.mxu0 %vm56_vm0, %v342_v58  ;;  %390 = vst.msk [vmem:[%s2789_s5 + $0x80] sm:$0xff] %vm56_vm0, %v358_v62  ;;  %1257 = vmatprep.mubr.msk.f32.mxu1 %vm56_vm0, %v358_v62  ;;  %v307_v4 = vmul.f32 %v1940_v11, %v273_v61  ;;  %v308_v6 = vmul.f32 %v1940_v11, %v274_v44 }
  0xb6   :  { %375 = vst.msk [vmem:[%s2789_s5 + $0x8] sm:$0xff] %vm56_vm0, %v343_v7  ;;  %391 = vst.msk [vmem:[%s2789_s5 + $0x88] sm:$0xff] %vm56_vm0, %v359_v8  ;;  %v323_v26 = vmul.f32 %v1940_v11, %v289_v13  ;;  %1234 = vmatmul.mubr.msk.f32.vlgmr.msra.gmra.mxu0 %vm56_vm0, %v343_v7  ;;  %1258 = vmatmul.mubr.msk.f32.vlgmr.msra.gmra.mxu1 %vm56_vm0, %v359_v8  ;;  %v324_v53 = vmul.f32 %v1940_v11, %v290_v45 }
  0xb7   :  { %376 = vst.msk [vmem:[%s2789_s5 + $0x10] sm:$0xff] %vm56_vm0, %v344_v48  ;;  %377 = vst.msk [vmem:[%s2789_s5 + $0x18] sm:$0xff] %vm56_vm0, %v345_v9  ;;  %v309_v12 = vmul.f32 %v1940_v11, %v275_v16  ;;  %v310_v29 = vmul.f32 %v1940_v11, %v276_v49  ;;  %1236 = vmatprep.mubr.msk.f32.mxu0 %vm56_vm0, %v344_v48  ;;  %1260 = vmatprep.mubr.msk.f32.mxu1 %vm56_vm0, %v360_v3 }
  0xb8   :  { %392 = vst.msk [vmem:[%s2789_s5 + $0x90] sm:$0xff] %vm56_vm0, %v360_v3  ;;  %393 = vst.msk [vmem:[%s2789_s5 + $0x98] sm:$0xff] %vm56_vm0, %v361_v25  ;;  %v346_v30 = vadd.f32 %v1945_v28, %v307_v4  ;;  %v347_v33 = vadd.f32 %v1945_v28, %v308_v6  ;;  %v362_v34 = vadd.f32 %v1945_v28, %v323_v26 }
  0xb9   :  { %v363_v37 = vadd.f32 %v1945_v28, %v324_v53  ;;  %v348_v17 = vadd.f32 %v1945_v28, %v309_v12  ;;  %v349_v39 = vadd.f32 %v1945_v28, %v310_v29  ;;  %v325_v43 = vmul.f32 %v1940_v11, %v1900_v18 }
  0xba   :  { %378 = vst.msk [vmem:[%s2789_s5 + $0x20] sm:$0xff] %vm56_vm0, %v346_v30  ;;  %379 = vst.msk [vmem:[%s2789_s5 + $0x28] sm:$0xff] %vm56_vm0, %v347_v33  ;;  %v326_v46 = vmul.f32 %v1940_v11, %v1903_v20  ;;  %v311_v47 = vmul.f32 %v1940_v11, %v1906_v52  ;;  %v312_v50 = vmul.f32 %v1940_v11, %v1909_v22  ;;  %1237 = vmatmul.mubr.msk.f32.gmra.mxu0 %vm56_vm0, %v345_v9 }
  0xbb   :  { %394 = vst.msk [vmem:[%s2789_s5 + $0xa0] sm:$0xff] %vm56_vm0, %v362_v34  ;;  %v327_v51 = vmul.f32 %v1940_v11, %v1912_v5  ;;  %1261 = vmatmul.mubr.msk.f32.gmra.mxu1 %vm56_vm0, %v361_v25  ;;  %395 = vst.msk [vmem:[%s2789_s5 + $0xa8] sm:$0xff] %vm56_vm0, %v363_v37  ;;  %v364_v54 = vadd.f32 %v1945_v28, %v325_v43  ;;  %v328_v55 = vmul.f32 %v1940_v11, %v1915_v56 }
  0xbc   :  { %380 = vst.msk [vmem:[%s2789_s5 + $0x30] sm:$0xff] %vm56_vm0, %v348_v17  ;;  %381 = vst.msk [vmem:[%s2789_s5 + $0x38] sm:$0xff] %vm56_vm0, %v349_v39  ;;  %v313_v57 = vmul.f32 %v1940_v11, %v1918_v10  ;;  %1239 = vmatprep.mubr.msk.f32.mxu0 %vm56_vm0, %v346_v30  ;;  %1263 = vmatprep.mubr.msk.f32.mxu1 %vm56_vm0, %v362_v34  ;;  %v365_v40 = vadd.f32 %v1945_v28, %v326_v46 }
  0xbd   :  { %v350_v60 = vadd.f32 %v1945_v28, %v311_v47  ;;  %v351_v61 = vadd.f32 %v1945_v28, %v312_v50  ;;  %396 = vst.msk [vmem:[%s2789_s5 + $0xb0] sm:$0xff] %vm56_vm0, %v364_v54  ;;  %v366_v44 = vadd.f32 %v1945_v28, %v327_v51  ;;  %v367_v13 = vadd.f32 %v1945_v28, %v328_v55 }
  0xbe   :  { %v352_v45 = vadd.f32 %v1945_v28, %v313_v57  ;;  %v314_v16 = vmul.f32 %v1940_v11, %v1921_v14  ;;  %397 = vst.msk [vmem:[%s2789_s5 + $0xb8] sm:$0xff] %vm56_vm0, %v365_v40  ;;  %v329_v49 = vmul.f32 %v1940_v11, %v1924_v59  ;;  %v330_v18 = vmul.f32 %v1940_v11, %v1927_v41 }
  0xbf   :  { %382 = vst.msk [vmem:[%s2789_s5 + $0x40] sm:$0xff] %vm56_vm0, %v350_v60  ;;  %383 = vst.msk [vmem:[%s2789_s5 + $0x48] sm:$0xff] %vm56_vm0, %v351_v61  ;;  %v315_v20 = vmul.f32 %v1940_v11, %v1930_v21  ;;  %v316_v52 = vmul.f32 %v1940_v11, %v1933_v63  ;;  %1240 = vmatmul.mubr.msk.f32.gmra.mxu0 %vm56_vm0, %v347_v33  ;;  %1264 = vmatmul.mubr.msk.f32.gmra.mxu1 %vm56_vm0, %v363_v37 }
  0xc0   :  { %398 = vst.msk [vmem:[%s2789_s5 + $0xc0] sm:$0xff] %vm56_vm0, %v366_v44  ;;  %399 = vst.msk [vmem:[%s2789_s5 + $0xc8] sm:$0xff] %vm56_vm0, %v367_v13  ;;  %v353_v22 = vadd.f32 %v1945_v28, %v314_v16  ;;  %v331_v5 = vmul.f32 %v1940_v11, %v1936_v2  ;;  %v332_v56 = vmul.f32 %v1940_v11, %v1938_v24  ;;  %1242 = vmatprep.mubr.msk.f32.mxu0 %vm56_vm0, %v348_v17 }
  0xc1   :  { %384 = vst.msk [vmem:[%s2789_s5 + $0x50] sm:$0xff] %vm56_vm0, %v352_v45  ;;  %1266 = vmatprep.mubr.msk.f32.mxu1 %vm56_vm0, %v364_v54  ;;  %v368_v10 = vadd.f32 %v1945_v28, %v329_v49  ;;  %v369_v14 = vadd.f32 %v1945_v28, %v330_v18  ;;  %v354_v59 = vadd.f32 %v1945_v28, %v315_v20 }
  0xc2   :  { %385 = vst.msk [vmem:[%s2789_s5 + $0x58] sm:$0xff] %vm56_vm0, %v353_v22  ;;  %v355_v41 = vadd.f32 %v1945_v28, %v316_v52  ;;  %v370_v21 = vadd.f32 %v1945_v28, %v331_v5  ;;  %v371_v63 = vadd.f32 %v1945_v28, %v332_v56  ;;  %v317_v2 = vmul.f32 %v1940_v11, %v1948_v15 }
  0xc3   :  { %400 = vst.msk [vmem:[%s2789_s5 + $0xd0] sm:$0xff] %vm56_vm0, %v368_v10  ;;  %401 = vst.msk [vmem:[%s2789_s5 + $0xd8] sm:$0xff] %vm56_vm0, %v369_v14  ;;  %v318_v24 = vmul.f32 %v1940_v11, %v1951_v31  ;;  %v333_v15 = vmul.f32 %v1940_v11, %v1954_v35  ;;  %v334_v23 = vmul.f32 %v1940_v11, %v1956_v19  ;;  %1243 = vmatmul.mubr.msk.f32.gmra.mxu0 %vm56_vm0, %v349_v39 }
  0xc4   :  { %386 = vst.msk [vmem:[%s2789_s5 + $0x60] sm:$0xff] %vm56_vm0, %v354_v59  ;;  %1267 = vmatmul.mubr.msk.f32.gmra.mxu1 %vm56_vm0, %v365_v40  ;;  %387 = vst.msk [vmem:[%s2789_s5 + $0x68] sm:$0xff] %vm56_vm0, %v355_v41  ;;  %v356_v11 = vadd.f32 %v1945_v28, %v317_v2  ;;  %1245 = vmatprep.mubr.msk.f32.mxu0 %vm56_vm0, %v350_v60 }
  0xc5   :  { %402 = vst.msk [vmem:[%s2789_s5 + $0xe0] sm:$0xff] %vm56_vm0, %v370_v21  ;;  %403 = vst.msk [vmem:[%s2789_s5 + $0xe8] sm:$0xff] %vm56_vm0, %v371_v63  ;;  %1269 = vmatprep.mubr.msk.f32.mxu1 %vm56_vm0, %v366_v44  ;;  %v357_v31 = vadd.f32 %v1945_v28, %v318_v24  ;;  %v372_v35 = vadd.f32 %v1945_v28, %v333_v15  ;;  %v373_v19 = vadd.f32 %v1945_v28, %v334_v23  ;;  %v2203_v28 = vld [vmem:[%s2790_s4] ss:$0 sm:$0xff]  ;;  %s1309_s4 = smov 96  }
  0xc6   :  { %388 = vst.msk [vmem:[%s2789_s5 + $0x70] sm:$0xff] %vm56_vm0, %v356_v11 }
  0xc7   :  { %389 = vst.msk [vmem:[%s2789_s5 + $0x78] sm:$0xff] %vm56_vm0, %v357_v31  ;;  %404 = vst.msk [vmem:[%s2789_s5 + $0xf0] sm:$0xff] %vm56_vm0, %v372_v35  ;;  %1246 = vmatmul.mubr.msk.f32.gmra.mxu0 %vm56_vm0, %v351_v61 }
  0xc8   :  { %405 = vst.msk [vmem:[%s2789_s5 + $0xf8] sm:$0xff] %vm56_vm0, %v373_v19  ;;  %1270 = vmatmul.mubr.msk.f32.gmra.mxu1 %vm56_vm0, %v367_v13  ;;  %1248 = vmatprep.mubr.msk.f32.mxu0 %vm56_vm0, %v352_v45 }
  0xc9   :  { %1272 = vmatprep.mubr.msk.f32.mxu1 %vm56_vm0, %v368_v10 }
  0xcb   :  { %1249 = vmatmul.mubr.msk.f32.gmra.mxu0 %vm56_vm0, %v353_v22 }
  0xcc   :  { %1273 = vmatmul.mubr.msk.f32.gmra.mxu1 %vm56_vm0, %v369_v14  ;;  %1251 = vmatprep.mubr.msk.f32.mxu0 %vm56_vm0, %v354_v59 }
  0xcd   :  { %1275 = vmatprep.mubr.msk.f32.mxu1 %vm56_vm0, %v370_v21 }
  0xcf   :  { %1252 = vmatmul.mubr.msk.f32.gmra.mxu0 %vm56_vm0, %v355_v41 }
  0xd0   :  { %1276 = vmatmul.mubr.msk.f32.gmra.mxu1 %vm56_vm0, %v371_v63  ;;  %1254 = vmatprep.mubr.msk.f32.mxu0 %vm56_vm0, %v356_v11 }
  0xd1   :  { %1278 = vmatprep.mubr.msk.f32.mxu1 %vm56_vm0, %v372_v35 }
  0xd3   :  { %1255 = vmatmul.mubr.msk.f32.gmra.mxu0 %vm56_vm0, %v357_v31 }
  0xd4   :  { %1279 = vmatmul.mubr.msk.f32.gmra.mxu1 %vm56_vm0, %v373_v19 }
 0x176   :  { %v1235_v27 = vpop.f32.mrf.mxu0  ;;  %v1259_v32 = vpop.f32.mrf.mxu1 }
 0x177   :  { %v629_v36 = vadd.f32 %v1235_v27, %v2203_v28  ;;  %v709_v0 = vadd.f32 %v1259_v32, %v2203_v28 }
 0x178   :  { %v623_v38 = vpop.f32.mrf.mxu0  ;;  %v703_v42 = vpop.f32.mrf.mxu1 }
 0x179   :  { %783 = vst.msk [vmem:[%s2791_s6 + $0x8] sm:$0xff] %vm56_vm0, %v629_v36  ;;  %799 = vst.msk [vmem:[%s2791_s6 + $0x88] sm:$0xff] %vm56_vm0, %v709_v0  ;;  %v624_v1 = vadd.f32 %v2203_v28, %v623_v38  ;;  %v704_v58 = vadd.f32 %v2203_v28, %v703_v42  ;;  %880 = vrot.lane.b32.xlu1 %v709_v0, %s1309_s4  ;;  %848 = vrot.lane.b32.xlu0 %v629_v36, %s1309_s4 }
 0x17a   :  { %v1238_v62 = vpop.f32.mrf.mxu0 }
 0x17b   :  { %v1262_v7 = vpop.f32.mrf.mxu1  ;;  %782 = vst.msk [vmem:[%s2791_s6] sm:$0xff] %vm56_vm0, %v624_v1  ;;  %798 = vst.msk [vmem:[%s2791_s6 + $0x80] sm:$0xff] %vm56_vm0, %v704_v58  ;;  %v639_v8 = vadd.f32 %v1238_v62, %v2203_v28 }
 0x17c   :  { %v2229_v48 = vadd.f32 %v1262_v7, %v2203_v28  ;;  %v633_v9 = vpop.f32.mrf.mxu0 }
 0x17d   :  { %v713_v3 = vpop.f32.mrf.mxu1  ;;  %976 = vrot.lane.b32.xlu1 %v629_v36, %s1310_s25  ;;  %846 = vrot.lane.b32.xlu0 %v624_v1, %s1309_s4  ;;  %785 = vst.msk [vmem:[%s2791_s6 + $0x18] sm:$0xff] %vm56_vm0, %v639_v8  ;;  %v2238_v25 = vadd.f32 %v2203_v28, %v633_v9 }
 0x17e   :  { %801 = vst.msk [vmem:[%s2791_s6 + $0x98] sm:$0xff] %vm56_vm0, %v2229_v48  ;;  %v2246_v4 = vadd.f32 %v2203_v28, %v713_v3 }
 0x17f   :  { %v1241_v6 = vpop.f32.mrf.mxu0  ;;  %v1265_v26 = vpop.f32.mrf.mxu1  ;;  %784 = vst.msk [vmem:[%s2791_s6 + $0x10] sm:$0xff] %vm56_vm0, %v2238_v25 }
 0x180   :  { %800 = vst.msk [vmem:[%s2791_s6 + $0x90] sm:$0xff] %vm56_vm0, %v2246_v4  ;;  %v2259_v53 = vadd.f32 %v1241_v6, %v2203_v28  ;;  %v2262_v12 = vadd.f32 %v1265_v26, %v2203_v28 }
 0x181   :  { %v643_v29 = vpop.f32.mrf.mxu0  ;;  %v723_v30 = vpop.f32.mrf.mxu1  ;;  %1008 = vrot.lane.b32.xlu1 %v709_v0, %s1310_s25  ;;  %878 = vrot.lane.b32.xlu0 %v704_v58, %s1309_s4 }
 0x182   :  { %787 = vst.msk [vmem:[%s2791_s6 + $0x28] sm:$0xff] %vm56_vm0, %v2259_v53  ;;  %v2272_v33 = vadd.f32 %v2203_v28, %v643_v29  ;;  %803 = vst.msk [vmem:[%s2791_s6 + $0xa8] sm:$0xff] %vm56_vm0, %v2262_v12  ;;  %v2280_v34 = vadd.f32 %v2203_v28, %v723_v30 }
 0x183   :  { %v1244_v37 = vpop.f32.mrf.mxu0 }
 0x184   :  { %v1268_v17 = vpop.f32.mrf.mxu1  ;;  %786 = vst.msk [vmem:[%s2791_s6 + $0x20] sm:$0xff] %vm56_vm0, %v2272_v33  ;;  %802 = vst.msk [vmem:[%s2791_s6 + $0xa0] sm:$0xff] %vm56_vm0, %v2280_v34  ;;  %v2293_v39 = vadd.f32 %v1244_v37, %v2203_v28 }
 0x185   :  { %v2296_v43 = vadd.f32 %v1268_v17, %v2203_v28  ;;  %v653_v46 = vpop.f32.mrf.mxu0  ;;  %852 = vrot.lane.b32.xlu1 %v639_v8, %s1309_s4  ;;  %974 = vrot.lane.b32.xlu0 %v624_v1, %s1310_s25 }
 0x186   :  { %v733_v47 = vpop.f32.mrf.mxu1  ;;  %789 = vst.msk [vmem:[%s2791_s6 + $0x38] sm:$0xff] %vm56_vm0, %v2293_v39  ;;  %v2306_v50 = vadd.f32 %v2203_v28, %v653_v46 }
 0x187   :  { %805 = vst.msk [vmem:[%s2791_s6 + $0xb8] sm:$0xff] %vm56_vm0, %v2296_v43  ;;  %v2314_v51 = vadd.f32 %v2203_v28, %v733_v47  ;;  %v1247_v54 = vpop.f32.mrf.mxu0 }
 0x188   :  { %v1271_v55 = vpop.f32.mrf.mxu1  ;;  %788 = vst.msk [vmem:[%s2791_s6 + $0x30] sm:$0xff] %vm56_vm0, %v2306_v50  ;;  %v2327_v57 = vadd.f32 %v1247_v54, %v2203_v28 }
 0x189   :  { %804 = vst.msk [vmem:[%s2791_s6 + $0xb0] sm:$0xff] %vm56_vm0, %v2314_v51  ;;  %v2330_v40 = vadd.f32 %v1271_v55, %v2203_v28  ;;  %v663_v60 = vpop.f32.mrf.mxu0  ;;  %884 = vrot.lane.b32.xlu1 %v2229_v48, %s1309_s4  ;;  %1006 = vrot.lane.b32.xlu0 %v704_v58, %s1310_s25 }
 0x18a   :  { %v743_v61 = vpop.f32.mrf.mxu1  ;;  %791 = vst.msk [vmem:[%s2791_s6 + $0x48] sm:$0xff] %vm56_vm0, %v2327_v57  ;;  %v2341_v44 = vadd.f32 %v2203_v28, %v663_v60 }
 0x18b   :  { %807 = vst.msk [vmem:[%s2791_s6 + $0xc8] sm:$0xff] %vm56_vm0, %v2330_v40  ;;  %v2349_v13 = vadd.f32 %v2203_v28, %v743_v61  ;;  %v1250_v45 = vpop.f32.mrf.mxu0 }
 0x18c   :  { %v1274_v16 = vpop.f32.mrf.mxu1  ;;  %790 = vst.msk [vmem:[%s2791_s6 + $0x40] sm:$0xff] %vm56_vm0, %v2341_v44  ;;  %v2362_v49 = vadd.f32 %v1250_v45, %v2203_v28 }
 0x18d   :  { %806 = vst.msk [vmem:[%s2791_s6 + $0xc0] sm:$0xff] %vm56_vm0, %v2349_v13  ;;  %v2365_v18 = vadd.f32 %v1274_v16, %v2203_v28  ;;  %v673_v20 = vpop.f32.mrf.mxu0  ;;  %980 = vrot.lane.b32.xlu1 %v639_v8, %s1310_s25  ;;  %882 = vrot.lane.b32.xlu0 %v2246_v4, %s1309_s4 }
 0x18e   :  { %v753_v52 = vpop.f32.mrf.mxu1  ;;  %793 = vst.msk [vmem:[%s2791_s6 + $0x58] sm:$0xff] %vm56_vm0, %v2362_v49  ;;  %v674_v22 = vadd.f32 %v2203_v28, %v673_v20 }
 0x18f   :  { %809 = vst.msk [vmem:[%s2791_s6 + $0xd8] sm:$0xff] %vm56_vm0, %v2365_v18  ;;  %v754_v5 = vadd.f32 %v2203_v28, %v753_v52  ;;  %v1253_v56 = vpop.f32.mrf.mxu0 }
 0x190   :  { %v1277_v10 = vpop.f32.mrf.mxu1  ;;  %792 = vst.msk [vmem:[%s2791_s6 + $0x50] sm:$0xff] %vm56_vm0, %v674_v22  ;;  %v689_v14 = vadd.f32 %v1253_v56, %v2203_v28 }
 0x191   :  { %808 = vst.msk [vmem:[%s2791_s6 + $0xd0] sm:$0xff] %vm56_vm0, %v754_v5  ;;  %v769_v59 = vadd.f32 %v1277_v10, %v2203_v28  ;;  %v683_v41 = vpop.f32.mrf.mxu0  ;;  %1012 = vrot.lane.b32.xlu1 %v2229_v48, %s1310_s25  ;;  %978 = vrot.lane.b32.xlu0 %v2238_v25, %s1310_s25 }
 0x192   :  { %v763_v21 = vpop.f32.mrf.mxu1  ;;  %795 = vst.msk [vmem:[%s2791_s6 + $0x68] sm:$0xff] %vm56_vm0, %v689_v14  ;;  %v684_v63 = vadd.f32 %v2203_v28, %v683_v41 }
 0x193   :  { %811 = vst.msk [vmem:[%s2791_s6 + $0xe8] sm:$0xff] %vm56_vm0, %v769_v59  ;;  %v764_v2 = vadd.f32 %v2203_v28, %v763_v21  ;;  %v1256_v24 = vpop.f32.mrf.mxu0 }
 0x194   :  { %v1280_v15 = vpop.f32.mrf.mxu1  ;;  %794 = vst.msk [vmem:[%s2791_s6 + $0x60] sm:$0xff] %vm56_vm0, %v684_v63  ;;  %v2415_v23 = vadd.f32 %v1256_v24, %v2203_v28 }
 0x195   :  { %810 = vst.msk [vmem:[%s2791_s6 + $0xe0] sm:$0xff] %vm56_vm0, %v764_v2  ;;  %v2418_v11 = vadd.f32 %v1280_v15, %v2203_v28  ;;  %v693_v31 = vpop.f32.mrf.mxu0  ;;  %850 = vrot.lane.b32.xlu1 %v2238_v25, %s1309_s4  ;;  %1010 = vrot.lane.b32.xlu0 %v2246_v4, %s1310_s25 }
 0x196   :  { %v773_v35 = vpop.f32.mrf.mxu1  ;;  %797 = vst.msk [vmem:[%s2791_s6 + $0x78] sm:$0xff] %vm56_vm0, %v2415_v23  ;;  %v694_v19 = vadd.f32 %v2203_v28, %v693_v31 }
 0x197   :  { %813 = vst.msk [vmem:[%s2791_s6 + $0xf8] sm:$0xff] %vm56_vm0, %v2418_v11  ;;  %v2436_v27 = vadd.f32 %v2203_v28, %v773_v35 }
 0x198   :  { %796 = vst.msk [vmem:[%s2791_s6 + $0x70] sm:$0xff] %vm56_vm0, %v694_v19 }
 0x199   :  { %812 = vst.msk [vmem:[%s2791_s6 + $0xf0] sm:$0xff] %vm56_vm0, %v2436_v27  ;;  %856 = vrot.lane.b32.xlu1 %v2259_v53, %s1309_s4  ;;  %854 = vrot.lane.b32.xlu0 %v2272_v33, %s1309_s4 }
 0x19d   :  { %888 = vrot.lane.b32.xlu1 %v2262_v12, %s1309_s4  ;;  %886 = vrot.lane.b32.xlu0 %v2280_v34, %s1309_s4 }
 0x1a1   :  { %984 = vrot.lane.b32.xlu1 %v2259_v53, %s1310_s25  ;;  %982 = vrot.lane.b32.xlu0 %v2272_v33, %s1310_s25 }
 0x1a5   :  { %1016 = vrot.lane.b32.xlu1 %v2262_v12, %s1310_s25  ;;  %1014 = vrot.lane.b32.xlu0 %v2280_v34, %s1310_s25 }
 0x1a9   :  { %860 = vrot.lane.b32.xlu1 %v2293_v39, %s1309_s4  ;;  %858 = vrot.lane.b32.xlu0 %v2306_v50, %s1309_s4 }
 0x1ad   :  { %892 = vrot.lane.b32.xlu1 %v2296_v43, %s1309_s4  ;;  %890 = vrot.lane.b32.xlu0 %v2314_v51, %s1309_s4 }
 0x1b1   :  { %988 = vrot.lane.b32.xlu1 %v2293_v39, %s1310_s25  ;;  %986 = vrot.lane.b32.xlu0 %v2306_v50, %s1310_s25 }
 0x1b5   :  { %1020 = vrot.lane.b32.xlu1 %v2296_v43, %s1310_s25  ;;  %1018 = vrot.lane.b32.xlu0 %v2314_v51, %s1310_s25 }
 0x1b9   :  { %864 = vrot.lane.b32.xlu1 %v2327_v57, %s1309_s4  ;;  %862 = vrot.lane.b32.xlu0 %v2341_v44, %s1309_s4 }
 0x1bd   :  { %896 = vrot.lane.b32.xlu1 %v2330_v40, %s1309_s4  ;;  %894 = vrot.lane.b32.xlu0 %v2349_v13, %s1309_s4 }
 0x1c1   :  { %992 = vrot.lane.b32.xlu1 %v2327_v57, %s1310_s25  ;;  %990 = vrot.lane.b32.xlu0 %v2341_v44, %s1310_s25 }
 0x1c5   :  { %1024 = vrot.lane.b32.xlu1 %v2330_v40, %s1310_s25  ;;  %1022 = vrot.lane.b32.xlu0 %v2349_v13, %s1310_s25 }
 0x1c9   :  { %868 = vrot.lane.b32.xlu1 %v2362_v49, %s1309_s4  ;;  %866 = vrot.lane.b32.xlu0 %v674_v22, %s1309_s4 }
 0x1cd   :  { %900 = vrot.lane.b32.xlu1 %v2365_v18, %s1309_s4  ;;  %898 = vrot.lane.b32.xlu0 %v754_v5, %s1309_s4 }
 0x1d1   :  { %996 = vrot.lane.b32.xlu1 %v2362_v49, %s1310_s25  ;;  %994 = vrot.lane.b32.xlu0 %v674_v22, %s1310_s25 }
 0x1d5   :  { %1028 = vrot.lane.b32.xlu1 %v2365_v18, %s1310_s25  ;;  %1026 = vrot.lane.b32.xlu0 %v754_v5, %s1310_s25 }
 0x1d9   :  { %872 = vrot.lane.b32.xlu1 %v689_v14, %s1309_s4  ;;  %870 = vrot.lane.b32.xlu0 %v684_v63, %s1309_s4 }
 0x1dd   :  { %904 = vrot.lane.b32.xlu1 %v769_v59, %s1309_s4  ;;  %902 = vrot.lane.b32.xlu0 %v764_v2, %s1309_s4 }
 0x1e1   :  { %1000 = vrot.lane.b32.xlu1 %v689_v14, %s1310_s25  ;;  %998 = vrot.lane.b32.xlu0 %v684_v63, %s1310_s25 }
 0x1e5   :  { %1032 = vrot.lane.b32.xlu1 %v769_v59, %s1310_s25  ;;  %1030 = vrot.lane.b32.xlu0 %v764_v2, %s1310_s25 }
 0x1e9   :  { %876 = vrot.lane.b32.xlu1 %v2415_v23, %s1309_s4  ;;  %874 = vrot.lane.b32.xlu0 %v694_v19, %s1309_s4 }
 0x1eb   :  { %v881_v28 = vpop.permute.xlu1 %880  ;;  %v849_v32 = vpop.permute.xlu0 %848 }
 0x1ec   :  { %959 = vst.msk [vmem:[%s2792_s7 + $0x88] sm:$0xff] %vm56_vm0, %v881_v28  ;;  %943 = vst.msk [vmem:[%s2792_s7 + $0x8] sm:$0xff] %vm56_vm0, %v849_v32 }
 0x1ed   :  { %908 = vrot.lane.b32.xlu1 %v2418_v11, %s1309_s4  ;;  %906 = vrot.lane.b32.xlu0 %v2436_v27, %s1309_s4 }
 0x1ef   :  { %v977_v36 = vpop.permute.xlu1 %976  ;;  %v847_v0 = vpop.permute.xlu0 %846 }
 0x1f0   :  { %1071 = vst.msk [vmem:[%s2793_s8 + $0x8] sm:$0xff] %vm56_vm0, %v977_v36  ;;  %942 = vst.msk [vmem:[%s2792_s7] sm:$0xff] %vm56_vm0, %v847_v0 }
 0x1f1   :  { %1004 = vrot.lane.b32.xlu1 %v2415_v23, %s1310_s25  ;;  %1002 = vrot.lane.b32.xlu0 %v694_v19, %s1310_s25 }
 0x1f3   :  { %v1009_v38 = vpop.permute.xlu1 %1008  ;;  %v879_v42 = vpop.permute.xlu0 %878 }
 0x1f4   :  { %1087 = vst.msk [vmem:[%s2793_s8 + $0x88] sm:$0xff] %vm56_vm0, %v1009_v38  ;;  %958 = vst.msk [vmem:[%s2792_s7 + $0x80] sm:$0xff] %vm56_vm0, %v879_v42 }
 0x1f5   :  { %1036 = vrot.lane.b32.xlu1 %v2418_v11, %s1310_s25  ;;  %1034 = vrot.lane.b32.xlu0 %v2436_v27, %s1310_s25 }
 0x1f7   :  { %v853_v1 = vpop.permute.xlu1 %852  ;;  %v975_v58 = vpop.permute.xlu0 %974 }
 0x1f8   :  { %945 = vst.msk [vmem:[%s2792_s7 + $0x18] sm:$0xff] %vm56_vm0, %v853_v1  ;;  %1070 = vst.msk [vmem:[%s2793_s8] sm:$0xff] %vm56_vm0, %v975_v58 }
 0x1fb   :  { %v885_v62 = vpop.permute.xlu1 %884  ;;  %v1007_v7 = vpop.permute.xlu0 %1006 }
 0x1fc   :  { %961 = vst.msk [vmem:[%s2792_s7 + $0x98] sm:$0xff] %vm56_vm0, %v885_v62  ;;  %1086 = vst.msk [vmem:[%s2793_s8 + $0x80] sm:$0xff] %vm56_vm0, %v1007_v7 }
 0x1ff   :  { %v981_v8 = vpop.permute.xlu1 %980  ;;  %v883_v48 = vpop.permute.xlu0 %882 }
 0x200   :  { %1073 = vst.msk [vmem:[%s2793_s8 + $0x18] sm:$0xff] %vm56_vm0, %v981_v8  ;;  %960 = vst.msk [vmem:[%s2792_s7 + $0x90] sm:$0xff] %vm56_vm0, %v883_v48 }
 0x203   :  { %v1013_v9 = vpop.permute.xlu1 %1012  ;;  %v979_v3 = vpop.permute.xlu0 %978 }
 0x204   :  { %1089 = vst.msk [vmem:[%s2793_s8 + $0x98] sm:$0xff] %vm56_vm0, %v1013_v9  ;;  %1072 = vst.msk [vmem:[%s2793_s8 + $0x10] sm:$0xff] %vm56_vm0, %v979_v3 }
 0x207   :  { %v851_v25 = vpop.permute.xlu1 %850  ;;  %v1011_v4 = vpop.permute.xlu0 %1010 }
 0x208   :  { %944 = vst.msk [vmem:[%s2792_s7 + $0x10] sm:$0xff] %vm56_vm0, %v851_v25  ;;  %1088 = vst.msk [vmem:[%s2793_s8 + $0x90] sm:$0xff] %vm56_vm0, %v1011_v4 }
 0x20b   :  { %v857_v6 = vpop.permute.xlu1 %856  ;;  %v855_v26 = vpop.permute.xlu0 %854 }
 0x20c   :  { %947 = vst.msk [vmem:[%s2792_s7 + $0x28] sm:$0xff] %vm56_vm0, %v857_v6  ;;  %946 = vst.msk [vmem:[%s2792_s7 + $0x20] sm:$0xff] %vm56_vm0, %v855_v26 }
 0x20f   :  { %v889_v53 = vpop.permute.xlu1 %888  ;;  %v887_v12 = vpop.permute.xlu0 %886 }
 0x210   :  { %963 = vst.msk [vmem:[%s2792_s7 + $0xa8] sm:$0xff] %vm56_vm0, %v889_v53  ;;  %962 = vst.msk [vmem:[%s2792_s7 + $0xa0] sm:$0xff] %vm56_vm0, %v887_v12 }
 0x213   :  { %v985_v29 = vpop.permute.xlu1 %984  ;;  %v983_v30 = vpop.permute.xlu0 %982 }
 0x214   :  { %1075 = vst.msk [vmem:[%s2793_s8 + $0x28] sm:$0xff] %vm56_vm0, %v985_v29  ;;  %1074 = vst.msk [vmem:[%s2793_s8 + $0x20] sm:$0xff] %vm56_vm0, %v983_v30 }
 0x217   :  { %v1017_v33 = vpop.permute.xlu1 %1016  ;;  %v1015_v34 = vpop.permute.xlu0 %1014 }
 0x218   :  { %1091 = vst.msk [vmem:[%s2793_s8 + $0xa8] sm:$0xff] %vm56_vm0, %v1017_v33  ;;  %1090 = vst.msk [vmem:[%s2793_s8 + $0xa0] sm:$0xff] %vm56_vm0, %v1015_v34 }
 0x21b   :  { %v861_v37 = vpop.permute.xlu1 %860  ;;  %v859_v17 = vpop.permute.xlu0 %858 }
 0x21c   :  { %949 = vst.msk [vmem:[%s2792_s7 + $0x38] sm:$0xff] %vm56_vm0, %v861_v37  ;;  %948 = vst.msk [vmem:[%s2792_s7 + $0x30] sm:$0xff] %vm56_vm0, %v859_v17 }
 0x21f   :  { %v893_v39 = vpop.permute.xlu1 %892  ;;  %v891_v43 = vpop.permute.xlu0 %890 }
 0x220   :  { %965 = vst.msk [vmem:[%s2792_s7 + $0xb8] sm:$0xff] %vm56_vm0, %v893_v39  ;;  %964 = vst.msk [vmem:[%s2792_s7 + $0xb0] sm:$0xff] %vm56_vm0, %v891_v43 }
 0x223   :  { %v989_v46 = vpop.permute.xlu1 %988  ;;  %v987_v47 = vpop.permute.xlu0 %986 }
 0x224   :  { %1077 = vst.msk [vmem:[%s2793_s8 + $0x38] sm:$0xff] %vm56_vm0, %v989_v46  ;;  %1076 = vst.msk [vmem:[%s2793_s8 + $0x30] sm:$0xff] %vm56_vm0, %v987_v47 }
 0x227   :  { %v1021_v50 = vpop.permute.xlu1 %1020  ;;  %v1019_v51 = vpop.permute.xlu0 %1018 }
 0x228   :  { %1093 = vst.msk [vmem:[%s2793_s8 + $0xb8] sm:$0xff] %vm56_vm0, %v1021_v50  ;;  %1092 = vst.msk [vmem:[%s2793_s8 + $0xb0] sm:$0xff] %vm56_vm0, %v1019_v51 }
 0x22b   :  { %v865_v54 = vpop.permute.xlu1 %864  ;;  %v863_v55 = vpop.permute.xlu0 %862 }
 0x22c   :  { %951 = vst.msk [vmem:[%s2792_s7 + $0x48] sm:$0xff] %vm56_vm0, %v865_v54  ;;  %950 = vst.msk [vmem:[%s2792_s7 + $0x40] sm:$0xff] %vm56_vm0, %v863_v55 }
 0x22f   :  { %v897_v57 = vpop.permute.xlu1 %896  ;;  %v895_v40 = vpop.permute.xlu0 %894 }
 0x230   :  { %967 = vst.msk [vmem:[%s2792_s7 + $0xc8] sm:$0xff] %vm56_vm0, %v897_v57  ;;  %966 = vst.msk [vmem:[%s2792_s7 + $0xc0] sm:$0xff] %vm56_vm0, %v895_v40 }
 0x233   :  { %v993_v60 = vpop.permute.xlu1 %992  ;;  %v991_v61 = vpop.permute.xlu0 %990 }
 0x234   :  { %1079 = vst.msk [vmem:[%s2793_s8 + $0x48] sm:$0xff] %vm56_vm0, %v993_v60  ;;  %1078 = vst.msk [vmem:[%s2793_s8 + $0x40] sm:$0xff] %vm56_vm0, %v991_v61 }
 0x237   :  { %v1025_v44 = vpop.permute.xlu1 %1024  ;;  %v1023_v13 = vpop.permute.xlu0 %1022 }
 0x238   :  { %1095 = vst.msk [vmem:[%s2793_s8 + $0xc8] sm:$0xff] %vm56_vm0, %v1025_v44  ;;  %1094 = vst.msk [vmem:[%s2793_s8 + $0xc0] sm:$0xff] %vm56_vm0, %v1023_v13 }
 0x23b   :  { %v869_v45 = vpop.permute.xlu1 %868  ;;  %v867_v16 = vpop.permute.xlu0 %866 }
 0x23c   :  { %953 = vst.msk [vmem:[%s2792_s7 + $0x58] sm:$0xff] %vm56_vm0, %v869_v45  ;;  %952 = vst.msk [vmem:[%s2792_s7 + $0x50] sm:$0xff] %vm56_vm0, %v867_v16 }
 0x23f   :  { %v901_v49 = vpop.permute.xlu1 %900  ;;  %v899_v18 = vpop.permute.xlu0 %898 }
 0x240   :  { %969 = vst.msk [vmem:[%s2792_s7 + $0xd8] sm:$0xff] %vm56_vm0, %v901_v49  ;;  %968 = vst.msk [vmem:[%s2792_s7 + $0xd0] sm:$0xff] %vm56_vm0, %v899_v18 }
 0x243   :  { %v997_v20 = vpop.permute.xlu1 %996  ;;  %v995_v52 = vpop.permute.xlu0 %994 }
 0x244   :  { %1081 = vst.msk [vmem:[%s2793_s8 + $0x58] sm:$0xff] %vm56_vm0, %v997_v20  ;;  %1080 = vst.msk [vmem:[%s2793_s8 + $0x50] sm:$0xff] %vm56_vm0, %v995_v52 }
 0x247   :  { %v1029_v22 = vpop.permute.xlu1 %1028  ;;  %v1027_v5 = vpop.permute.xlu0 %1026 }
 0x248   :  { %1097 = vst.msk [vmem:[%s2793_s8 + $0xd8] sm:$0xff] %vm56_vm0, %v1029_v22  ;;  %1096 = vst.msk [vmem:[%s2793_s8 + $0xd0] sm:$0xff] %vm56_vm0, %v1027_v5 }
 0x24b   :  { %v873_v56 = vpop.permute.xlu1 %872  ;;  %v871_v10 = vpop.permute.xlu0 %870 }
 0x24c   :  { %955 = vst.msk [vmem:[%s2792_s7 + $0x68] sm:$0xff] %vm56_vm0, %v873_v56  ;;  %954 = vst.msk [vmem:[%s2792_s7 + $0x60] sm:$0xff] %vm56_vm0, %v871_v10 }
 0x24f   :  { %v905_v14 = vpop.permute.xlu1 %904  ;;  %v903_v59 = vpop.permute.xlu0 %902 }
 0x250   :  { %971 = vst.msk [vmem:[%s2792_s7 + $0xe8] sm:$0xff] %vm56_vm0, %v905_v14  ;;  %970 = vst.msk [vmem:[%s2792_s7 + $0xe0] sm:$0xff] %vm56_vm0, %v903_v59 }
 0x253   :  { %v1001_v41 = vpop.permute.xlu1 %1000  ;;  %v999_v21 = vpop.permute.xlu0 %998 }
 0x254   :  { %1083 = vst.msk [vmem:[%s2793_s8 + $0x68] sm:$0xff] %vm56_vm0, %v1001_v41  ;;  %1082 = vst.msk [vmem:[%s2793_s8 + $0x60] sm:$0xff] %vm56_vm0, %v999_v21 }
 0x257   :  { %v1033_v63 = vpop.permute.xlu1 %1032  ;;  %v1031_v2 = vpop.permute.xlu0 %1030 }
 0x258   :  { %1099 = vst.msk [vmem:[%s2793_s8 + $0xe8] sm:$0xff] %vm56_vm0, %v1033_v63  ;;  %1098 = vst.msk [vmem:[%s2793_s8 + $0xe0] sm:$0xff] %vm56_vm0, %v1031_v2 }
 0x25b   :  { %v877_v24 = vpop.permute.xlu1 %876  ;;  %v875_v15 = vpop.permute.xlu0 %874 }
 0x25c   :  { %957 = vst.msk [vmem:[%s2792_s7 + $0x78] sm:$0xff] %vm56_vm0, %v877_v24  ;;  %956 = vst.msk [vmem:[%s2792_s7 + $0x70] sm:$0xff] %vm56_vm0, %v875_v15 }
 0x25f   :  { %v909_v23 = vpop.permute.xlu1 %908  ;;  %v907_v11 = vpop.permute.xlu0 %906 }
 0x260   :  { %973 = vst.msk [vmem:[%s2792_s7 + $0xf8] sm:$0xff] %vm56_vm0, %v909_v23  ;;  %972 = vst.msk [vmem:[%s2792_s7 + $0xf0] sm:$0xff] %vm56_vm0, %v907_v11 }
 0x263   :  { %v1005_v31 = vpop.permute.xlu1 %1004  ;;  %v1003_v35 = vpop.permute.xlu0 %1002 }
 0x264   :  { %1085 = vst.msk [vmem:[%s2793_s8 + $0x78] sm:$0xff] %vm56_vm0, %v1005_v31  ;;  %1084 = vst.msk [vmem:[%s2793_s8 + $0x70] sm:$0xff] %vm56_vm0, %v1003_v35 }
 0x267   :  { %v1037_v19 = vpop.permute.xlu1 %1036  ;;  %v1035_v27 = vpop.permute.xlu0 %1034 }
 0x268   :  { %1101 = vst.msk [vmem:[%s2793_s8 + $0xf8] sm:$0xff] %vm56_vm0, %v1037_v19  ;;  %1100 = vst.msk [vmem:[%s2793_s8 + $0xf0] sm:$0xff] %vm56_vm0, %v1035_v27 }

</bundles_post_ra>
